<compile_context>
chip_gen: v6e
topology: v6e:2x2x1
jax: 0.10.0
libtpu: 0.0.40
codegen_flags: <defaults>
</compile_context>

<pallas_src>
import functools

import jax
import jax.numpy as jnp
import numpy as np
from jax import lax
from jax.experimental import pallas as pl
from jax.experimental.pallas import tpu as pltpu


def sa_fuse_kernel(gamma_ref,              # SMEM (1,)            : gamma scalar
                   ef_ref,                 # VMEM (1, C_ef, Np)   : ef (proj input + residual)
                   sf_ref,                 # VMEM (1, C_sf, Np)   : sf
                   attn_ref,               # VMEM (1, C_attn, Np) : Attn input
                   wvq_ef_ref,             # (C_out + C8, C_ef)   : stacked [Wv; Wq] (ef cols)
                   wvq_sf_ref,             # (C_out + C8, C_sf)   : stacked [Wv; Wq] (sf cols)
                   bvq_ref,                # (C_out + C8, 1)      : stacked [bv; bq]
                   wk_ref,                 # (C8, C_attn)
                   bk_ref,                 # (C8, 1)
                   o_ref,                  # VMEM (1, C_out, Np)
                   *, c_out, n_valid):
    ef = ef_ref[0]        # (C_ef, Np)
    sf = sf_ref[0]        # (C_sf, Np)
    a = attn_ref[0]       # (C_attn, Np)

    # Fused [V; Q] 1x1-conv projection, split by input slab (no cat(ef, sf)).
    vq = (jnp.dot(wvq_ef_ref[...], ef, preferred_element_type=jnp.float32)
          + jnp.dot(wvq_sf_ref[...], sf, preferred_element_type=jnp.float32)
          + bvq_ref[...])                                        # (C_out + C8, Np)
    v = vq[:c_out]        # (C_out, Np)  -- sublane-aligned static slice
    q = vq[c_out:]        # (C8, Np)

    k = jnp.dot(wk_ref[...], a, preferred_element_type=jnp.float32) + bk_ref[...]  # (C8, Np)

    # Transposed logits: s[m, n] = sum_c k[c, m] * q[c, n]   -> (Np, Np)
    s = lax.dot_general(k, q, (((0,), (0,)), ((), ())),
                        preferred_element_type=jnp.float32)

    if n_valid is not None:
        # Padded key rows must not contribute to the softmax.
        row = lax.broadcasted_iota(jnp.int32, s.shape, 0)
        s = jnp.where(row < n_valid, s, -jnp.inf)

    # Softmax over keys (axis 0) with deferred normalization.
    m = jnp.max(s, axis=0, keepdims=True)                        # (1, Np)
    e = jnp.exp(s - m)                                           # (Np, Np)
    denom = jnp.sum(e, axis=0, keepdims=True)                    # (1, Np)

    # out_unnorm[c, n] = sum_m v[c, m] * e[m, n]  (no transposes needed)
    out = jnp.dot(v, e, preferred_element_type=jnp.float32)      # (C_out, Np)

    inv = pl.reciprocal(denom, approx=True)                      # EUP slot, (1, Np)
    o_ref[0] = gamma_ref[0] * out * inv + ef


def sa_fuse_pallas(ef, sf, attn_in, params):
    B, C_ef, W, H = ef.shape
    C_sf = sf.shape[1]
    C_attn = attn_in.shape[1]
    C8 = params["wq"].shape[0]
    C_out = params["wv"].shape[0]
    assert C_out == C_ef, "residual requires out_channels == ef channels"

    N = W * H
    N_pad = ((N + 127) // 128) * 128     # lane-dense, 128-multiple last dim
    pad = N_pad - N

    ef_flat = ef.reshape(B, C_ef, N)
    sf_flat = sf.reshape(B, C_sf, N)
    a_flat = attn_in.reshape(B, C_attn, N)
    if pad:
        ef_flat = jnp.pad(ef_flat, ((0, 0), (0, 0), (0, pad)))
        sf_flat = jnp.pad(sf_flat, ((0, 0), (0, 0), (0, pad)))
        a_flat = jnp.pad(a_flat, ((0, 0), (0, 0), (0, pad)))

    # Split Q/V weights column-wise (ef vs sf inputs) and stack [V; Q] rows so
    # both projections come out of a single matmul per input slab.
    wq, wv = params["wq"], params["wv"]
    wvq_ef = jnp.concatenate([wv[:, :C_ef], wq[:, :C_ef]], axis=0)   # (C_out+C8, C_ef)
    wvq_sf = jnp.concatenate([wv[:, C_ef:], wq[:, C_ef:]], axis=0)   # (C_out+C8, C_sf)
    bvq = jnp.concatenate([params["bv"], params["bq"]], axis=0).reshape(C_out + C8, 1)
    wk = params["wk"]
    bk = params["bk"].reshape(C8, 1)
    gamma = params["gamma"].reshape(1)

    kernel = functools.partial(sa_fuse_kernel, c_out=C_out,
                               n_valid=(N if pad else None))

    out_flat = pl.pallas_call(
        kernel,
        out_shape=jax.ShapeDtypeStruct((B, C_out, N_pad), jnp.float32),
        grid=(B,),
        in_specs=[
            pl.BlockSpec(memory_space=pltpu.MemorySpace.SMEM),           # gamma
            pl.BlockSpec((1, C_ef, N_pad), lambda b: (b, 0, 0)),         # ef
            pl.BlockSpec((1, C_sf, N_pad), lambda b: (b, 0, 0)),         # sf
            pl.BlockSpec((1, C_attn, N_pad), lambda b: (b, 0, 0)),       # Attn
            pl.BlockSpec((C_out + C8, C_ef), lambda b: (0, 0)),          # wvq_ef
            pl.BlockSpec((C_out + C8, C_sf), lambda b: (0, 0)),          # wvq_sf
            pl.BlockSpec((C_out + C8, 1), lambda b: (0, 0)),             # bvq
            pl.BlockSpec((C8, C_attn), lambda b: (0, 0)),                # wk
            pl.BlockSpec((C8, 1), lambda b: (0, 0)),                     # bk
        ],
        out_specs=pl.BlockSpec((1, C_out, N_pad), lambda b: (b, 0, 0)),
        compiler_params=pltpu.CompilerParams(
            dimension_semantics=("parallel",)),
    )(gamma, ef_flat, sf_flat, a_flat, wvq_ef, wvq_sf, bvq, wk, bk)

    return out_flat[:, :, :N].reshape(B, C_out, W, H)


def sa_fuse_ref(ef, sf, attn_in, params):
    """Pure-JAX reference mirroring the PyTorch forward exactly."""
    B, C, W, H = ef.shape
    N = W * H
    x = jnp.concatenate([ef, sf], axis=1)

    def conv1x1(inp, w, b):
        y = jnp.einsum("oc,bchw->bohw", w, inp, precision="highest")
        return y + b[None, :, None, None]

    proj_q = conv1x1(x, params["wq"], params["bq"]).reshape(B, -1, N).transpose(0, 2, 1)
    proj_k = conv1x1(attn_in, params["wk"], params["bk"]).reshape(B, -1, N)
    logits = jnp.einsum("bnc,bcm->bnm", proj_q, proj_k, precision="highest")
    attention = jax.nn.softmax(logits, axis=-1)
    proj_v = conv1x1(x, params["wv"], params["bv"]).reshape(B, -1, N)
    out = jnp.einsum("bcm,bnm->bcn", proj_v, attention, precision="highest")
    out = out.reshape(B, C, W, H)
    return params["gamma"] * out + ef


def _make_params(key, in_channels, out_channels, attn_channels):
    C8 = out_channels // 8
    keys = jax.random.split(key, 7)
    return {
        "wq": 0.1 * jax.random.normal(keys[0], (C8, in_channels), dtype=jnp.float32),
        "bq": 0.1 * jax.random.normal(keys[1], (C8,), dtype=jnp.float32),
        "wk": 0.1 * jax.random.normal(keys[2], (C8, attn_channels), dtype=jnp.float32),
        "bk": 0.1 * jax.random.normal(keys[3], (C8,), dtype=jnp.float32),
        "wv": 0.1 * jax.random.normal(keys[4], (out_channels, in_channels), dtype=jnp.float32),
        "bv": 0.1 * jax.random.normal(keys[5], (out_channels,), dtype=jnp.float32),
        "gamma": jnp.array(0.25, dtype=jnp.float32),
    }


if __name__ == "__main__":
    key = jax.random.PRNGKey(0)

    # --- main test: W*H already a multiple of 128 (no padding path) ---------
    B, C_ef, C_sf, C_attn, W, H = 2, 16, 16, 8, 16, 16
    in_channels = C_ef + C_sf          # 32
    out_channels = C_ef                # 16

    keys = jax.random.split(key, 4)
    ef = jax.random.normal(keys[0], (B, C_ef, W, H), dtype=jnp.float32)
    sf = jax.random.normal(keys[1], (B, C_sf, W, H), dtype=jnp.float32)
    attn_in = jax.random.normal(keys[2], (B, C_attn, W, H), dtype=jnp.float32)
    params = _make_params(keys[3], in_channels, out_channels, C_attn)

    out = jax.block_until_ready(sa_fuse_pallas(ef, sf, attn_in, params))
    ref = jax.block_until_ready(sa_fuse_ref(ef, sf, attn_in, params))
    np.testing.assert_allclose(np.asarray(out), np.asarray(ref), rtol=1e-2, atol=1e-2)

    # --- secondary test: non-128-multiple spatial size (padding + key mask) -
    W2, H2 = 10, 10
    keys2 = jax.random.split(jax.random.PRNGKey(1), 3)
    ef2 = jax.random.normal(keys2[0], (B, C_ef, W2, H2), dtype=jnp.float32)
    sf2 = jax.random.normal(keys2[1], (B, C_sf, W2, H2), dtype=jnp.float32)
    attn2 = jax.random.normal(keys2[2], (B, C_attn, W2, H2), dtype=jnp.float32)

    out2 = jax.block_until_ready(sa_fuse_pallas(ef2, sf2, attn2, params))
    ref2 = jax.block_until_ready(sa_fuse_ref(ef2, sf2, attn2, params))
    np.testing.assert_allclose(np.asarray(out2), np.asarray(ref2), rtol=1e-2, atol=1e-2)

    print("KERNEL_OK")
</pallas_src>

<mosaic_0001>
module attributes {stable_mosaic.version = 11 : i64} {
  func.func @sa_fuse_kernel(%arg0: i32, %arg1: memref<1xf32, #tpu.memory_space<smem>>, %arg2: memref<1x16x256xf32, #tpu.memory_space<vmem>>, %arg3: memref<1x16x256xf32, #tpu.memory_space<vmem>>, %arg4: memref<1x8x256xf32, #tpu.memory_space<vmem>>, %arg5: memref<18x16xf32, #tpu.memory_space<vmem>>, %arg6: memref<18x16xf32, #tpu.memory_space<vmem>>, %arg7: memref<18x1xf32, #tpu.memory_space<vmem>>, %arg8: memref<2x8xf32, #tpu.memory_space<vmem>>, %arg9: memref<2x1xf32, #tpu.memory_space<vmem>>, %arg10: memref<1x16x256xf32, #tpu.memory_space<vmem>>) attributes {dimension_semantics = [#tpu.dimension_semantics<parallel>], iteration_bounds = array<i64: 2>, scalar_prefetch = 0 : i64, scratch_operands = 0 : i64, tpu.core_type = #tpu.core_type<tc>, window_params = [{transform_indices = @transform_0, window_bounds = array<i64: 1>}, {transform_indices = @transform_1, window_bounds = array<i64: 1, 16, 256>}, {transform_indices = @transform_2, window_bounds = array<i64: 1, 16, 256>}, {transform_indices = @transform_3, window_bounds = array<i64: 1, 8, 256>}, {pipeline_mode = #tpu.pipeline_mode<synchronous>, transform_indices = @transform_4, window_bounds = array<i64: 18, 16>}, {pipeline_mode = #tpu.pipeline_mode<synchronous>, transform_indices = @transform_5, window_bounds = array<i64: 18, 16>}, {pipeline_mode = #tpu.pipeline_mode<synchronous>, transform_indices = @transform_6, window_bounds = array<i64: 18, 1>}, {pipeline_mode = #tpu.pipeline_mode<synchronous>, transform_indices = @transform_7, window_bounds = array<i64: 2, 8>}, {pipeline_mode = #tpu.pipeline_mode<synchronous>, transform_indices = @transform_8, window_bounds = array<i64: 2, 1>}, {transform_indices = @transform_9, window_bounds = array<i64: 1, 16, 256>}]} {
    %c0 = arith.constant 0 : index
    %c0_0 = arith.constant 0 : index
    %c0_1 = arith.constant 0 : index
    %0 = vector.load %arg2[%c0, %c0_0, %c0_1] : memref<1x16x256xf32, #tpu.memory_space<vmem>>, vector<1x16x256xf32>
    %1 = vector.shape_cast %0 : vector<1x16x256xf32> to vector<16x256xf32>
    %c0_2 = arith.constant 0 : index
    %c0_3 = arith.constant 0 : index
    %c0_4 = arith.constant 0 : index
    %2 = vector.load %arg3[%c0_2, %c0_3, %c0_4] : memref<1x16x256xf32, #tpu.memory_space<vmem>>, vector<1x16x256xf32>
    %3 = vector.shape_cast %2 : vector<1x16x256xf32> to vector<16x256xf32>
    %c0_5 = arith.constant 0 : index
    %c0_6 = arith.constant 0 : index
    %c0_7 = arith.constant 0 : index
    %4 = vector.load %arg4[%c0_5, %c0_6, %c0_7] : memref<1x8x256xf32, #tpu.memory_space<vmem>>, vector<1x8x256xf32>
    %5 = vector.shape_cast %4 : vector<1x8x256xf32> to vector<8x256xf32>
    %c0_8 = arith.constant 0 : index
    %c0_9 = arith.constant 0 : index
    %6 = vector.load %arg5[%c0_8, %c0_9] : memref<18x16xf32, #tpu.memory_space<vmem>>, vector<18x16xf32>
    %cst = arith.constant dense<0.000000e+00> : vector<18x256xf32>
    %7 = tpu.matmul %6, %1, %cst {dimension_numbers = #tpu.dot_dimension_numbers<[1], [0], [0], [1], [0, 0, 1, 1], [], []>} : vector<18x16xf32>, vector<16x256xf32>, vector<18x256xf32> -> vector<18x256xf32>
    %c0_10 = arith.constant 0 : index
    %c0_11 = arith.constant 0 : index
    %8 = vector.load %arg6[%c0_10, %c0_11] : memref<18x16xf32, #tpu.memory_space<vmem>>, vector<18x16xf32>
    %cst_12 = arith.constant dense<0.000000e+00> : vector<18x256xf32>
    %9 = tpu.matmul %8, %3, %cst_12 {dimension_numbers = #tpu.dot_dimension_numbers<[1], [0], [0], [1], [0, 0, 1, 1], [], []>} : vector<18x16xf32>, vector<16x256xf32>, vector<18x256xf32> -> vector<18x256xf32>
    %10 = arith.addf %7, %9 : vector<18x256xf32>
    %c0_13 = arith.constant 0 : index
    %c0_14 = arith.constant 0 : index
    %11 = vector.load %arg7[%c0_13, %c0_14] : memref<18x1xf32, #tpu.memory_space<vmem>>, vector<18x1xf32>
    %12 = vector.broadcast %11 : vector<18x1xf32> to vector<18x256xf32>
    %13 = arith.addf %10, %12 : vector<18x256xf32>
    %14 = vector.extract_strided_slice %13 {offsets = [0, 0], sizes = [16, 256], strides = [1, 1]} : vector<18x256xf32> to vector<16x256xf32>
    %15 = vector.extract_strided_slice %13 {offsets = [16, 0], sizes = [2, 256], strides = [1, 1]} : vector<18x256xf32> to vector<2x256xf32>
    %c0_15 = arith.constant 0 : index
    %c0_16 = arith.constant 0 : index
    %16 = vector.load %arg8[%c0_15, %c0_16] : memref<2x8xf32, #tpu.memory_space<vmem>>, vector<2x8xf32>
    %cst_17 = arith.constant dense<0.000000e+00> : vector<2x256xf32>
    %17 = tpu.matmul %16, %5, %cst_17 {dimension_numbers = #tpu.dot_dimension_numbers<[1], [0], [0], [1], [0, 0, 1, 1], [], []>} : vector<2x8xf32>, vector<8x256xf32>, vector<2x256xf32> -> vector<2x256xf32>
    %c0_18 = arith.constant 0 : index
    %c0_19 = arith.constant 0 : index
    %18 = vector.load %arg9[%c0_18, %c0_19] : memref<2x1xf32, #tpu.memory_space<vmem>>, vector<2x1xf32>
    %19 = vector.broadcast %18 : vector<2x1xf32> to vector<2x256xf32>
    %20 = arith.addf %17, %19 : vector<2x256xf32>
    %cst_20 = arith.constant dense<0.000000e+00> : vector<256x256xf32>
    %21 = tpu.matmul %20, %15, %cst_20 {dimension_numbers = #tpu.dot_dimension_numbers<[0], [0], [1], [1], [0, 1, 1, 1], [], []>} : vector<2x256xf32>, vector<2x256xf32>, vector<256x256xf32> -> vector<256x256xf32>
    %cst_21 = arith.constant dense<0xFF800000> : vector<256xf32>
    %22 = vector.multi_reduction <maximumf>, %21, %cst_21 [0] : vector<256x256xf32> to vector<256xf32>
    %23 = vector.shape_cast %22 : vector<256xf32> to vector<1x256xf32>
    %24 = vector.broadcast %23 : vector<1x256xf32> to vector<256x256xf32>
    %25 = arith.subf %21, %24 : vector<256x256xf32>
    %26 = math.exp %25 : vector<256x256xf32>
    %cst_22 = arith.constant dense<0.000000e+00> : vector<256xf32>
    %27 = vector.multi_reduction <add>, %26, %cst_22 [0] : vector<256x256xf32> to vector<256xf32>
    %28 = vector.shape_cast %27 : vector<256xf32> to vector<1x256xf32>
    %cst_23 = arith.constant dense<0.000000e+00> : vector<16x256xf32>
    %29 = tpu.matmul %14, %26, %cst_23 {dimension_numbers = #tpu.dot_dimension_numbers<[1], [0], [0], [1], [0, 0, 1, 1], [], []>} : vector<16x256xf32>, vector<256x256xf32>, vector<16x256xf32> -> vector<16x256xf32>
    %30 = tpu.reciprocal %28 {approx = true} : vector<1x256xf32> -> vector<1x256xf32>
    %c0_24 = arith.constant 0 : index
    %31 = memref.load %arg1[%c0_24] : memref<1xf32, #tpu.memory_space<smem>>
    %32 = vector.broadcast %31 : f32 to vector<16x256xf32>
    %33 = arith.mulf %32, %29 : vector<16x256xf32>
    %34 = vector.broadcast %30 : vector<1x256xf32> to vector<16x256xf32>
    %35 = arith.mulf %33, %34 : vector<16x256xf32>
    %36 = arith.addf %35, %1 : vector<16x256xf32>
    %c0_25 = arith.constant 0 : index
    %c0_26 = arith.constant 0 : index
    %c0_27 = arith.constant 0 : index
    %37 = vector.load %arg10[%c0_25, %c0_26, %c0_27] : memref<1x16x256xf32, #tpu.memory_space<vmem>>, vector<1x16x256xf32>
    %38 = vector.shape_cast %37 : vector<1x16x256xf32> to vector<16x256xf32>
    %39 = vector.shape_cast %36 : vector<16x256xf32> to vector<1x16x256xf32>
    tpu.vector_store %arg10[%c0_25, %c0_26, %c0_27], %39 {strides = array<i32>} : memref<1x16x256xf32, #tpu.memory_space<vmem>>, vector<1x16x256xf32>,
    return
  }
  func.func @transform_0(%arg0: i32) -> i32 {
    %c0_i32 = arith.constant 0 : i32
    %c0_i32_0 = arith.constant 0 : i32
    return %c0_i32 : i32
  }
  func.func @transform_1(%arg0: i32) -> (i32, i32, i32) {
    %c0_i32 = arith.constant 0 : i32
    %c0_i32_0 = arith.constant 0 : i32
    %c0_i32_1 = arith.constant 0 : i32
    return %arg0, %c0_i32, %c0_i32_0 : i32, i32, i32
  }
  func.func @transform_2(%arg0: i32) -> (i32, i32, i32) {
    %c0_i32 = arith.constant 0 : i32
    %c0_i32_0 = arith.constant 0 : i32
    %c0_i32_1 = arith.constant 0 : i32
    return %arg0, %c0_i32, %c0_i32_0 : i32, i32, i32
  }
  func.func @transform_3(%arg0: i32) -> (i32, i32, i32) {
    %c0_i32 = arith.constant 0 : i32
    %c0_i32_0 = arith.constant 0 : i32
    %c0_i32_1 = arith.constant 0 : i32
    return %arg0, %c0_i32, %c0_i32_0 : i32, i32, i32
  }
  func.func @transform_4(%arg0: i32) -> (i32, i32) {
    %c0_i32 = arith.constant 0 : i32
    %c0_i32_0 = arith.constant 0 : i32
    %c0_i32_1 = arith.constant 0 : i32
    return %c0_i32, %c0_i32_0 : i32, i32
  }
  func.func @transform_5(%arg0: i32) -> (i32, i32) {
    %c0_i32 = arith.constant 0 : i32
    %c0_i32_0 = arith.constant 0 : i32
    %c0_i32_1 = arith.constant 0 : i32
    return %c0_i32, %c0_i32_0 : i32, i32
  }
  func.func @transform_6(%arg0: i32) -> (i32, i32) {
    %c0_i32 = arith.constant 0 : i32
    %c0_i32_0 = arith.constant 0 : i32
    %c0_i32_1 = arith.constant 0 : i32
    return %c0_i32, %c0_i32_0 : i32, i32
  }
  func.func @transform_7(%arg0: i32) -> (i32, i32) {
    %c0_i32 = arith.constant 0 : i32
    %c0_i32_0 = arith.constant 0 : i32
    %c0_i32_1 = arith.constant 0 : i32
    return %c0_i32, %c0_i32_0 : i32, i32
  }
  func.func @transform_8(%arg0: i32) -> (i32, i32) {
    %c0_i32 = arith.constant 0 : i32
    %c0_i32_0 = arith.constant 0 : i32
    %c0_i32_1 = arith.constant 0 : i32
    return %c0_i32, %c0_i32_0 : i32, i32
  }
  func.func @transform_9(%arg0: i32) -> (i32, i32, i32) {
    %c0_i32 = arith.constant 0 : i32
    %c0_i32_0 = arith.constant 0 : i32
    %c0_i32_1 = arith.constant 0 : i32
    return %arg0, %c0_i32, %c0_i32_0 : i32, i32, i32
  }
}

</mosaic_0001>

<bundles_post_ra>
// kernel: tpu_custom_call.1
= control target key start
LH: loop header
LB: loop body
LE: loop exit
PB: predicated region body
PF: predicated region fallthrough
CT: control target
= control target key end

     0   :  { %s2890_s0 = inlined_call_operand.<no memory space> [shape: f32[1], index: 0, kind: input, shape index: {}]   ;;  %s2891_s1 = inlined_call_operand.vmem [shape: f32[2,16,256], index: 1, kind: input, shape index: {}]   ;;  %s2892_s2 = inlined_call_operand.hbm [shape: f32[2,16,256], index: 2, kind: input, shape index: {}]   ;;  %s2893_s3 = inlined_call_operand.vmem [shape: f32[2,8,256], index: 3, kind: input, shape index: {}]   ;;  %s2894_s4 = inlined_call_operand.vmem [shape: f32[18,16], index: 4, kind: input, shape index: {}]   ;;  %s2895_s5 = inlined_call_operand.vmem [shape: f32[18,16], index: 5, kind: input, shape index: {}]   ;;  %s2896_s6 = inlined_call_operand.vmem [shape: f32[18,1], index: 6, kind: input, shape index: {}]   ;;  %s2897_s7 = inlined_call_operand.vmem [shape: f32[2,8], index: 7, kind: input, shape index: {}]   ;;  %s2898_s8 = inlined_call_operand.vmem [shape: f32[2,1], index: 8, kind: input, shape index: {}]   ;;  %s2899_s9 = inlined_call_operand.hbm [shape: f32[2,16,256], index: 9, kind: output, shape index: {}]  }
   0x1   :  { %14 = sst [smem:[#allocation2]] %s2890_s0 }
   0x2   :  { %15 = vsyncpa [#allocation4], 0 }
   0x3   :  { %17 = vsyncpa [#allocation4 + $0x1], 0 }
   0x4   :  { %18 = vsyncpa [#allocation5], 0 }
   0x5   :  { %20 = vsyncpa [#allocation5 + $0x1], 0  ;;  %s2079_s11 = smov 0   ;;  %s2081_s12 = smov 0  }
   0x6   :  { %s2083_s13 = smov 0   ;;  %s2085_s14 = smov 0  }
   0x7 LB: > { %s2100_s0 = sadd.s32 4294967295, %s2016_s14   ;;  %s1672_s15 = sadd.s32 4294967294, %s2016_s14   ;;  %s2016_s14 = sphi %s2085_s14, %s2985_s14   ;;  %s2012_s13 = sphi %s2083_s13, %s2984_s13   ;;  %s2008_s12 = sphi %s2081_s12, %s2983_s12   ;;  %s2004_s11 = sphi %s2079_s11, %s2982_s11  }
   0x8   : > { %s2104_s16 = sadd.s32 1, %s2016_s14   ;;  %s80_s17 = sadd.s32 1, %s2012_s13 }
   0x9   : > { %s77_s18 = ssub.s32 %s2016_s14, %s2104_s16  ;;  %p87_p0 = scmp.ne.s32.totalorder %s2012_s13, %s2008_s12 }
   0xa   : > { %p78_p1 = scmp.eq.s32.totalorder %s77_s18, 0  ;;  %p88_p2 = scmp.eq.s32.totalorder %s2016_s14, 0 }
   0xb   : > { %p93_p3 = scmp.ne.s32.totalorder %s2008_s12, %s2004_s11  ;;  %p94_p4 = scmp.eq.s32.totalorder %s2100_s0, 0 }
   0xc   : > { %s2116_s19 = scalar_select %p78_p1, %s2012_s13, %s80_s17  }
   0xd   : > { %p2118_p5 = por %p88_p2, %p87_p0  ;;  %p2122_p6 = por %p94_p4, %p93_p3 }
   0xe   : > { %2923 = sst [smem:[#allocation9_spill]] %s2116_s19  ;;  %p248_p7 = scmp.eq.s32.totalorder %s2100_s0, 1 }
   0xf   : > { %s2925_s21 = scalar_select %p2122_p6, 1, 0 }
  0x10   : > { %p254_p8 = scmp.eq.s32.totalorder %s1672_s15, 1  ;;  %p1747_p10 = scmp.lt.s32.totalorder %s2016_s14, 2 }
  0x11   : > { %p2129_p11 = por %p248_p7, %p87_p0  ;;  %s300_s24 = sand.u32 1, %s2012_s13  }
  0x12   : > { %p2133_p12 = por %p254_p8, %p93_p3  ;;  %s1731_s25 = sshll.u32 %s2016_s14, 9 }
  0x13   : > { %s2926_s22 = scalar_select %p2129_p11, 1, 0 }
  0x14   : > { %s2927_s23 = scalar_select %p2133_p12, 1, 0 }
  0x15   : > { %s1675_s26 = sshll.u32 %s300_s24, 5  ;;  %s2142_s29 = scalar_lea.hbm %s2892_s2, %s1731_s25 }
  0x16   : > { %s304_s30 = scalar_lea.vmem [#allocation3], %s1675_s26  ;;  %p2146_p13 = pnand %p1747_p10, %p2118_p5 }
  0x17   : > { %s311_s10 = sshll.u32 %s304_s30, 4  ;;  %s2152_s17 = scalar_lea.sflag [#allocation4], %s300_s24  ;;  %s2150_s10 = int_to_ptr.vmem [resolvable:$true] %s311_s10 }
  0x18   : > { %s1924_s18 = scalar_lea.hbm %s2142_s29, 512  ;;  %p1926_p1 = pneg %p2146_p13 }
  0x19   : > { %p1925_p0 = scmp.ne.s32.totalorder %s2142_s29, %s1924_s18  ;;  %s1929_s26 = scalar_lea.hbm %s2892_s2, 1024 }
  0x1a   : > { %p1930_p4 = scmp.lt.s32.totalorder %s2142_s29, %s2892_s2  ;;  %p1931_p5 = scmp.lt.s32.totalorder %s1929_s26, %s1924_s18 }
  0x1b   : > { %p1927_p2 = pnand %p1926_p1, %p1925_p0 }
  0x1c   : > { %p1932_p7 = por %p1931_p5, %p1930_p4 }
  0x1d   : > { %p1928_p3 = pneg %p1927_p2 }
  0x1f   : > { %p1933_p8 = pnand %p1932_p7, %p1928_p3 }
  0x21   : > { %1936 = shalt.err (!%p1933_p8)
}
  0x22   : > { %s1937_s24 = scalar_lea.vmem %s2150_s10, 512  ;;  %s2018_s30 = smov [#allocation3]  }
  0x23   : > { %p1938_p10 = scmp.ne.s32.totalorder %s2150_s10, %s1937_s24  ;;  %s1942_s19 = sshll.u32 %s2018_s30, 4  ;;  %s1943_s19 = int_to_ptr.vmem [resolvable:$false] %s1942_s19 }
  0x24   : > { %s1944_s25 = scalar_lea.vmem %s1943_s19, 1024  ;;  %p1945_p2 = scmp.lt.s32.totalorder %s2150_s10, %s1943_s19 }
  0x25   : > { %p1940_p9 = pnand %p1938_p10, %p1926_p1  ;;  %p1946_p12 = scmp.lt.s32.totalorder %s1944_s25, %s1937_s24 }
  0x27   : > { %p1941_p0 = pneg %p1940_p9  ;;  %p1947_p11 = por %p1946_p12, %p1945_p2 }
  0x29   : > { %p1948_p6 = pnand %p1947_p11, %p1941_p0 }
  0x2b   : > { %1951 = shalt.err (!%p1948_p6)
}
  0x2c   : > { %s2019_s18 = smov 256   ;;  %s2020_s27 = smov 16  }
  0x2d   : > { %1742 = dma.hbm_to_vmem [thread:$0]  (!%p2146_p13), %s2142_s29, 512, %s2150_s10, %s2152_s17, %s2019_s18, %s2019_s18, %s2020_s27  }
  0x2e   : > { %p1678_p9 = scmp.ge.s32.totalorder %s2016_s14, 1  ;;  %p327_p1 = scmp.lt.s32.totalorder %s2016_s14, 3 }
  0x30   : > { %p328_p3 = pnand %p1678_p9, %p327_p1 }
  0x32   : > { %331 = sbr.rel (%p328_p3) target bundleno = 1088 (0x440), region = 56 }
  0x37   : > { %s2176_s19 = sand.u32 1, %s2008_s12   ;;  %p2929_p6 = scmp.ne.s32.totalorder %s2925_s21, 0 }
  0x38   : > { %s1679_s26 = sshll.u32 %s2176_s19, 5  ;;  %s334_s20 = scalar_lea.sflag [#allocation4], %s2176_s19 }
  0x39   : > { %s337_s28 = scalar_lea.vmem [#allocation3], %s1679_s26 }
  0x3a   : > { %1995 = dma.done.wait (%p2929_p6), %s334_s20, 512  }
  0x3b   : > { %1997 = vsyncadd (%p2929_p6), %s334_s20, 4294966784  ;;  %p382_p11 = scmp.lt.s32.totalorder %s2100_s0, 1  ;;  %v2021_v0 = vmov 0.0   ;;  %v2022_v1 = vmov 0   ;;  %v399_v2 = vld [vmem:[%s337_s28 + $0x18] sm:$0xff]  ;;  %v398_v3 = vld [vmem:[%s337_s28 + $0x10] sm:$0xff] }
  0x3c   : > { %482 = vmatprep.mubr.f32.mxu0 %v2021_v0  ;;  %1787 = vset.pattern.permute.xlu0 %v2022_v1  ;;  %v397_v4 = vld [vmem:[%s337_s28 + $0x8] sm:$0xff]  ;;  %v396_v5 = vld [vmem:[%s337_s28] sm:$0xff]  ;;  %vm408_vm0 = vcmask 130048   ;;  %v595_v14 = vld [vmem:[%s2896_s6 + $0x10] sm:$0x3]  ;;  %vm624_vm1 = vcmask 64512  }
  0x3d   : > { %s383_s29 = scalar_select %p382_p11, %s2100_s0, 1  ;;  %931 = vmatprep.mubr.f32.mxu1 %v2021_v0  ;;  %446 = vmatprep.subr.mxu0 %v399_v2  ;;  %v405_v6 = vld [vmem:[%s2895_s5] sm:$0xff]  ;;  %v406_v12 = vld [vmem:[%s2895_s5 + $0x8] sm:$0xff]  ;;  %v407_v15 = vld [vmem:[%s2895_s5 + $0x10] sm:$0x3]  ;;  %vm860_vm2 = vcmask 1041408  }
  0x3e   : > { %447 = vmatpush1.msra.mxu0 %v398_v3  ;;  %v618_v11 = vld [vmem:[%s2898_s8] sm:$0x3]  ;;  %v594_v19 = vld [vmem:[%s2896_s6 + $0x8] sm:$0xff]  ;;  %v404_v21 = vld [vmem:[%s2894_s4 + $0x10] sm:$0x3]  ;;  %vm763_vm3 = vcmask 15360  }
  0x3f   : > { %s1732_s10 = sshll.u32 %s383_s29, 5  ;;  %s1733_s21 = sshll.u32 %s383_s29, 4  ;;  %448 = vmatprep.subr.mxu0 %v397_v4  ;;  %621 = vperm.xlu0 %1787, %v618_v11   ;;  %v593_v16 = vld [vmem:[%s2896_s6] sm:$0xff]  ;;  %v403_v20 = vld [vmem:[%s2894_s4 + $0x8] sm:$0xff] }
  0x40   : > { %s2193_s24 = scalar_lea.vmem %s2891_s1, %s1732_s10  ;;  %s391_s20 = scalar_lea.vmem %s2893_s3, %s1733_s21  ;;  %449 = vmatpush1.msra.mxu0 %v396_v5  ;;  %v402_v17 = vld [vmem:[%s2894_s4] sm:$0xff] }
  0x41   : > { %v395_v7 = vld [vmem:[%s2193_s24 + $0x18] sm:$0xff]  ;;  %v394_v8 = vld [vmem:[%s2193_s24 + $0x10] sm:$0xff]  ;;  %v393_v9 = vld [vmem:[%s2193_s24 + $0x8] sm:$0xff]  ;;  %1685 = vmatmul.mubr.msk.f32.vlgmr.msra.gmra.mxu0 %vm408_vm0, %v405_v6  ;;  %s1543_s27 = sld [smem:[#allocation2]]  ;;  %s381_s28 = scalar_lea.vmem [#allocation6], %s1679_s26 }
  0x42   : > { %538 = vmatprep.subr.mxu0 %v395_v7  ;;  %v392_v10 = vld [vmem:[%s2193_s24] sm:$0xff]  ;;  %488 = vmatprep.mubr.f32.mxu0 %v2021_v0  ;;  %v401_v13 = vld [vmem:[%s391_s20 + $0x8] sm:$0xff]  ;;  %s1575_s29 = sshll.u32 %s381_s28, 4  ;;  %s1734_s10 = sshll.u32 %s2100_s0, 9  ;;  %s2840_s29 = int_to_ptr.vmem [resolvable:$true] %s1575_s29 }
  0x43   : > { %539 = vmatpush1.msra.mxu0 %v394_v8  ;;  %608 = vperm.xlu0 %1787, %v595_v14   ;;  %v400_v18 = vld [vmem:[%s391_s20] sm:$0xff]  ;;  %s2846_s17 = scalar_lea.hbm %s2899_s9, %s1734_s10  ;;  %s1562_s21 = scalar_lea.sflag [#allocation5], %s2176_s19 }
  0x44   : > { %540 = vmatprep.subr.mxu0 %v393_v9  ;;  %v617_v22 = vld [vmem:[%s2897_s7] sm:$0x3]  ;;  %s1952_s0 = scalar_lea.vmem %s2840_s29, 512  ;;  %p2978_p13 = scmp.ne.s32.totalorder %s2926_s22, 0 }
  0x45   : > { %541 = vmatpush1.msra.mxu0 %v392_v10  ;;  %p1953_p12 = scmp.ne.s32.totalorder %s2840_s29, %s1952_s0  ;;  %s2023_s20 = smov [#allocation6]  }
  0x46   : > { %1686 = vmatmul.mubr.msk.f32.gmra.mxu0 %vm408_vm0, %v406_v12  ;;  %658 = vmatprep.subr.mxu0 %v401_v13  ;;  %s1956_s30 = sshll.u32 %s2023_s20, 4  ;;  %s1957_s30 = int_to_ptr.vmem [resolvable:$false] %s1956_s30 }
  0x47   : > { %494 = vmatprep.mubr.f32.mxu0 %v2021_v0  ;;  %598 = vperm.xlu0 %1787, %v593_v16   ;;  %p1954_p4 = pnand %p1953_p12, %p2978_p13  ;;  %s1958_s25 = scalar_lea.vmem %s1957_s30, 1024 }
  0x48   : > { %p1959_p7 = scmp.lt.s32.totalorder %s2840_s29, %s1957_s30  ;;  %p1960_p8 = scmp.lt.s32.totalorder %s1958_s25, %s1952_s0 }
  0x49   : > { %p1955_p5 = pneg %p1954_p4 }
  0x4a   : > { %1687 = vmatmul.mubr.msk.f32.gmra.mxu0 %vm408_vm0, %v407_v15  ;;  %p1961_p10 = por %p1960_p8, %p1959_p7 }
  0x4b   : > { %574 = vmatprep.mubr.f32.mxu0 %v2021_v0  ;;  %603 = vperm.xlu0 %1787, %v594_v19  }
  0x4c   : > { %p1962_p0 = pnand %p1961_p10, %p1955_p5 }
  0x4e   : > { %1688 = vmatmul.mubr.msk.f32.vlgmr.msra.gmra.mxu0 %vm408_vm0, %v402_v17 }
  0x4f   : > { %659 = vmatpush1.msra.mxu0 %v400_v18  ;;  %580 = vmatprep.mubr.f32.mxu0 %v2021_v0 }
  0x52   : > { %1689 = vmatmul.mubr.msk.f32.gmra.mxu0 %vm408_vm0, %v403_v20 }
  0x53   : > { %586 = vmatprep.mubr.f32.mxu0 %v2021_v0 }
  0x56   : > { %1690 = vmatmul.mubr.msk.f32.gmra.mxu0 %vm408_vm0, %v404_v21 }
  0x57   : > { %692 = vmatprep.mubr.f32.mxu0 %v2021_v0 }
  0x5a   : > { %1691 = vmatmul.mubr.msk.f32.vlgmr.msra.gmra.mxu0 %vm624_vm1, %v617_v22 }
  0xba   : > { %v622_v26 = vpop.permute.xlu0 %621 }
  0xbe   : > { %v609_v29 = vpop.permute.xlu0 %608 }
  0xc2   : > { %v2249_v35 = vpop.permute.xlu0 %598 }
  0xc3   : > { %2931 = vst [vmem:[#allocation11_spill] sm:$0xff] %v2249_v35 }
 0x101   : > { %v484_v23 = vpop.f32.mrf.mxu0 }
 0x103   : > { %v486_v24 = vpop.f32.mrf.mxu0 }
 0x106   : > { %v490_v25 = vpop.f32.mrf.mxu0 }
 0x108   : > { %v492_v27 = vpop.f32.mrf.mxu0 }
 0x10a   : > { %v496_v28 = vpop.f32.mrf.mxu0 }
 0x10c   : > { %v498_v30 = vpop.f32.mrf.mxu0 }
 0x10e   : > { %v576_v31 = vpop.f32.mrf.mxu0 }
 0x10f   : > { %v2247_v32 = vadd.f32 %v576_v31, %v484_v23 }
 0x110   : > { %v578_v33 = vpop.f32.mrf.mxu0 }
 0x111   : > { %2930 = vst [vmem:[#allocation10_spill] sm:$0xff] %v2247_v32  ;;  %v579_v34 = vadd.f32 %v578_v33, %v486_v24 }
 0x112   : > { %v582_v36 = vpop.f32.mrf.mxu0 }
 0x113   : > { %v612_v37 = vadd.f32 %v2249_v35, %v579_v34  ;;  %v2252_v38 = vadd.f32 %v582_v36, %v490_v25 }
 0x114   : > { %v584_v39 = vpop.f32.mrf.mxu0 }
 0x115   : > { %2932 = vst [vmem:[#allocation12_spill] sm:$0xff] %v2252_v38  ;;  %v2254_v40 = vadd.f32 %v584_v39, %v492_v27  ;;  %1528 = vmatprep.mubr.f32.mxu0 %v612_v37 }
 0x116   : > { %v588_v41 = vpop.f32.mrf.mxu0 }
 0x117   : > { %2933 = vst [vmem:[#allocation13_spill] sm:$0xff] %v2254_v40  ;;  %v589_v42 = vadd.f32 %v588_v41, %v496_v28 }
 0x118   : > { %v590_v43 = vpop.f32.mrf.mxu0 }
 0x119   : > { %v591_v44 = vadd.f32 %v590_v43, %v498_v30  ;;  %v615_v48 = vadd.f32 %v609_v29, %v589_v42 }
 0x11a   : > { %v694_v45 = vpop.f32.mrf.mxu0 }
 0x11b   : > { %v695_v46 = vadd.f32 %v694_v45, %v622_v26  ;;  %v616_v47 = vadd.f32 %v609_v29, %v591_v44 }
 0x11c   : > { %v696_v49 = vpop.f32.mrf.mxu0 }
 0x11d   : > { %699 = vxpose.xlu1.b32.start.end [1/1] (short) %v695_v46, 128  ;;  %1692 = vmatprep.subr.msk.mxu1 %vm860_vm2, %v616_v47  ;;  %v697_v50 = vadd.f32 %v696_v49, %v622_v26 }
 0x11e   : > { %1693 = vmatpush1.msk.msra.mxu1 %vm860_vm2, %v615_v48 }
 0x15a   : > { %731 = vxpose.xlu1.b32.start.end [1/1] (short) %v697_v50, 128 }
 0x199   : > { %v715_v51 = vpop.trf.xlu1 }
 0x19a   : > { %1694 = vmatmul.mubr.msk.f32.vlgmr.msra.gmra.mxu1 %vm763_vm3, %v715_v51 }
 0x19b   : > { %937 = vmatprep.mubr.f32.mxu1 %v2021_v0 }
 0x19d   : > { %v716_v52 = vpop.trf.xlu1 }
 0x19e   : > { %1695 = vmatmul.mubr.msk.f32.gmra.mxu1 %vm763_vm3, %v716_v52 }
 0x19f   : > { %943 = vmatprep.mubr.f32.mxu1 %v2021_v0 }
 0x1a1   : > { %v717_v53 = vpop.trf.xlu1 }
 0x1a2   : > { %1696 = vmatmul.mubr.msk.f32.gmra.mxu1 %vm763_vm3, %v717_v53 }
 0x1a3   : > { %949 = vmatprep.mubr.f32.mxu1 %v2021_v0 }
 0x1a5   : > { %v718_v54 = vpop.trf.xlu1 }
 0x1a6   : > { %1697 = vmatmul.mubr.msk.f32.gmra.mxu1 %vm763_vm3, %v718_v54 }
 0x1a7   : > { %955 = vmatprep.mubr.f32.mxu1 %v2021_v0 }
 0x1a9   : > { %v719_v55 = vpop.trf.xlu1 }
 0x1aa   : > { %1698 = vmatmul.mubr.msk.f32.gmra.mxu1 %vm763_vm3, %v719_v55 }
 0x1ab   : > { %961 = vmatprep.mubr.f32.mxu1 %v2021_v0 }
 0x1ad   : > { %v720_v56 = vpop.trf.xlu1 }
 0x1ae   : > { %1699 = vmatmul.mubr.msk.f32.gmra.mxu1 %vm763_vm3, %v720_v56 }
 0x1af   : > { %967 = vmatprep.mubr.f32.mxu1 %v2021_v0 }
 0x1b1   : > { %v721_v57 = vpop.trf.xlu1 }
 0x1b2   : > { %1700 = vmatmul.mubr.msk.f32.gmra.mxu1 %vm763_vm3, %v721_v57 }
 0x1b3   : > { %973 = vmatprep.mubr.f32.mxu1 %v2021_v0 }
 0x1b5   : > { %v722_v58 = vpop.trf.xlu1 }
 0x1b6   : > { %1701 = vmatmul.mubr.msk.f32.gmra.mxu1 %vm763_vm3, %v722_v58 }
 0x1b7   : > { %979 = vmatprep.mubr.f32.mxu1 %v2021_v0 }
 0x1b9   : > { %v723_v59 = vpop.trf.xlu1 }
 0x1ba   : > { %1702 = vmatmul.mubr.msk.f32.gmra.mxu1 %vm763_vm3, %v723_v59 }
 0x1bb   : > { %985 = vmatprep.mubr.f32.mxu1 %v2021_v0 }
 0x1bd   : > { %v724_v60 = vpop.trf.xlu1 }
 0x1be   : > { %1703 = vmatmul.mubr.msk.f32.gmra.mxu1 %vm763_vm3, %v724_v60 }
 0x1bf   : > { %991 = vmatprep.mubr.f32.mxu1 %v2021_v0 }
 0x1c1   : > { %v725_v61 = vpop.trf.xlu1 }
 0x1c2   : > { %1704 = vmatmul.mubr.msk.f32.gmra.mxu1 %vm763_vm3, %v725_v61 }
 0x1c3   : > { %997 = vmatprep.mubr.f32.mxu1 %v2021_v0 }
 0x1c5   : > { %v726_v62 = vpop.trf.xlu1 }
 0x1c6   : > { %1705 = vmatmul.mubr.msk.f32.gmra.mxu1 %vm763_vm3, %v726_v62 }
 0x1c7   : > { %1003 = vmatprep.mubr.f32.mxu1 %v2021_v0 }
 0x1c9   : > { %v727_v63 = vpop.trf.xlu1 }
 0x1ca   : > { %1706 = vmatmul.mubr.msk.f32.gmra.mxu1 %vm763_vm3, %v727_v63 }
 0x1cb   : > { %1009 = vmatprep.mubr.f32.mxu1 %v2021_v0 }
 0x1cd   : > { %v728_v1 = vpop.trf.xlu1 }
 0x1ce   : > { %1707 = vmatmul.mubr.msk.f32.gmra.mxu1 %vm763_vm3, %v728_v1 }
 0x1cf   : > { %1015 = vmatprep.mubr.f32.mxu1 %v2021_v0 }
 0x1d1   : > { %v729_v2 = vpop.trf.xlu1 }
 0x1d2   : > { %1708 = vmatmul.mubr.msk.f32.gmra.mxu1 %vm763_vm3, %v729_v2 }
 0x1d3   : > { %1021 = vmatprep.mubr.f32.mxu1 %v2021_v0 }
 0x1d5   : > { %v730_v3 = vpop.trf.xlu1 }
 0x1d6   : > { %1709 = vmatmul.mubr.msk.f32.gmra.mxu1 %vm763_vm3, %v730_v3 }
 0x1d7   : > { %1027 = vmatprep.mubr.f32.mxu1 %v2021_v0 }
 0x1d9   : > { %v747_v4 = vpop.trf.xlu1 }
 0x1da   : > { %1710 = vmatmul.mubr.msk.f32.gmra.mxu1 %vm763_vm3, %v747_v4 }
 0x1db   : > { %1033 = vmatprep.mubr.f32.mxu1 %v2021_v0 }
 0x1dd   : > { %v748_v5 = vpop.trf.xlu1 }
 0x1de   : > { %1711 = vmatmul.mubr.msk.f32.gmra.mxu1 %vm763_vm3, %v748_v5 }
 0x1df   : > { %1039 = vmatprep.mubr.f32.mxu1 %v2021_v0 }
 0x1e1   : > { %v749_v6 = vpop.trf.xlu1 }
 0x1e2   : > { %1712 = vmatmul.mubr.msk.f32.gmra.mxu1 %vm763_vm3, %v749_v6 }
 0x1e3   : > { %1045 = vmatprep.mubr.f32.mxu1 %v2021_v0 }
 0x1e5   : > { %v750_v7 = vpop.trf.xlu1 }
 0x1e6   : > { %1713 = vmatmul.mubr.msk.f32.gmra.mxu1 %vm763_vm3, %v750_v7 }
 0x1e7   : > { %1051 = vmatprep.mubr.f32.mxu1 %v2021_v0 }
 0x1e9   : > { %v751_v8 = vpop.trf.xlu1 }
 0x1ea   : > { %1714 = vmatmul.mubr.msk.f32.gmra.mxu1 %vm763_vm3, %v751_v8 }
 0x1eb   : > { %1057 = vmatprep.mubr.f32.mxu1 %v2021_v0 }
 0x1ed   : > { %v752_v9 = vpop.trf.xlu1 }
 0x1ee   : > { %1715 = vmatmul.mubr.msk.f32.gmra.mxu1 %vm763_vm3, %v752_v9 }
 0x1ef   : > { %1063 = vmatprep.mubr.f32.mxu1 %v2021_v0 }
 0x1f1   : > { %v753_v10 = vpop.trf.xlu1 }
 0x1f2   : > { %1716 = vmatmul.mubr.msk.f32.gmra.mxu1 %vm763_vm3, %v753_v10 }
 0x1f3   : > { %1069 = vmatprep.mubr.f32.mxu1 %v2021_v0 }
 0x1f5   : > { %v754_v11 = vpop.trf.xlu1 }
 0x1f6   : > { %1717 = vmatmul.mubr.msk.f32.gmra.mxu1 %vm763_vm3, %v754_v11 }
 0x1f7   : > { %1075 = vmatprep.mubr.f32.mxu1 %v2021_v0 }
 0x1f9   : > { %v755_v12 = vpop.trf.xlu1 }
 0x1fa   : > { %1718 = vmatmul.mubr.msk.f32.gmra.mxu1 %vm763_vm3, %v755_v12 }
 0x1fb   : > { %1081 = vmatprep.mubr.f32.mxu1 %v2021_v0 }
 0x1fd   : > { %v756_v13 = vpop.trf.xlu1 }
 0x1fe   : > { %1719 = vmatmul.mubr.msk.f32.gmra.mxu1 %vm763_vm3, %v756_v13 }
 0x1ff   : > { %1087 = vmatprep.mubr.f32.mxu1 %v2021_v0 }
 0x201   : > { %v757_v14 = vpop.trf.xlu1 }
 0x202   : > { %1720 = vmatmul.mubr.msk.f32.gmra.mxu1 %vm763_vm3, %v757_v14 }
 0x203   : > { %1093 = vmatprep.mubr.f32.mxu1 %v2021_v0 }
 0x205   : > { %v758_v15 = vpop.trf.xlu1 }
 0x206   : > { %1721 = vmatmul.mubr.msk.f32.gmra.mxu1 %vm763_vm3, %v758_v15 }
 0x207   : > { %1099 = vmatprep.mubr.f32.mxu1 %v2021_v0 }
 0x209   : > { %v759_v16 = vpop.trf.xlu1 }
 0x20a   : > { %1722 = vmatmul.mubr.msk.f32.gmra.mxu1 %vm763_vm3, %v759_v16 }
 0x20b   : > { %1105 = vmatprep.mubr.f32.mxu1 %v2021_v0 }
 0x20d   : > { %v760_v17 = vpop.trf.xlu1 }
 0x20e   : > { %1723 = vmatmul.mubr.msk.f32.gmra.mxu1 %vm763_vm3, %v760_v17 }
 0x20f   : > { %1111 = vmatprep.mubr.f32.mxu1 %v2021_v0 }
 0x211   : > { %v761_v18 = vpop.trf.xlu1 }
 0x212   : > { %1724 = vmatmul.mubr.msk.f32.gmra.mxu1 %vm763_vm3, %v761_v18 }
 0x213   : > { %1117 = vmatprep.mubr.f32.mxu1 %v2021_v0 }
 0x215   : > { %v762_v19 = vpop.trf.xlu1 }
 0x216   : > { %1725 = vmatmul.mubr.msk.f32.gmra.mxu1 %vm763_vm3, %v762_v19 }
 0x25a   : > { %v2319_v20 = vpop.f32.mrf.mxu1 }
 0x25c   : > { %v2321_v21 = vpop.f32.mrf.mxu1 }
 0x25e   : > { %v2323_v22 = vpop.f32.mrf.mxu1 }
 0x260   : > { %v2325_v23 = vpop.f32.mrf.mxu1 }
 0x261   : > { %2934 = vst [vmem:[#allocation14_spill] sm:$0xff] %v2325_v23 }
 0x262   : > { %v2327_v24 = vpop.f32.mrf.mxu1 }
 0x263   : > { %v1124_v9 = vmax.f32 %v2319_v20, %v2327_v24 }
 0x264   : > { %v2329_v25 = vpop.f32.mrf.mxu1 }
 0x265   : > { %2935 = vst [vmem:[#allocation15_spill] sm:$0xff] %v2329_v25 }
 0x266   : > { %v2331_v26 = vpop.f32.mrf.mxu1 }
 0x267   : > { %v1125_v10 = vmax.f32 %v2323_v22, %v2331_v26 }
 0x268   : > { %v2333_v27 = vpop.f32.mrf.mxu1 }
 0x269   : > { %2936 = vst [vmem:[#allocation16_spill] sm:$0xff] %v2333_v27 }
 0x26a   : > { %v2335_v0 = vpop.f32.mrf.mxu1 }
 0x26b   : > { %v1126_v12 = vmax.f32 %v1124_v9, %v2335_v0 }
 0x26c   : > { %v2337_v28 = vpop.f32.mrf.mxu1 }
 0x26e   : > { %v2339_v29 = vpop.f32.mrf.mxu1 }
 0x26f   : > { %v1127_v13 = vmax.f32 %v1125_v10, %v2339_v29 }
 0x270   : > { %v2341_v30 = vpop.f32.mrf.mxu1 }
 0x271   : > { %2937 = vst [vmem:[#allocation17_spill] sm:$0xff] %v2341_v30 }
 0x272   : > { %v2343_v31 = vpop.f32.mrf.mxu1 }
 0x273   : > { %v1128_v15 = vmax.f32 %v1126_v12, %v2343_v31 }
 0x274   : > { %v2345_v33 = vpop.f32.mrf.mxu1 }
 0x276   : > { %v2347_v34 = vpop.f32.mrf.mxu1 }
 0x277   : > { %v1129_v16 = vmax.f32 %v1127_v13, %v2347_v34 }
 0x278   : > { %v2349_v36 = vpop.f32.mrf.mxu1 }
 0x279   : > { %2938 = vst [vmem:[#allocation18_spill] sm:$0xff] %v2349_v36 }
 0x27a   : > { %v2351_v37 = vpop.f32.mrf.mxu1 }
 0x27b   : > { %2939 = vst [vmem:[#allocation19_spill] sm:$0xff] %v2351_v37  ;;  %v1130_v18 = vmax.f32 %v1128_v15, %v2351_v37 }
 0x27c   : > { %v2353_v39 = vpop.f32.mrf.mxu1 }
 0x27d   : > { %2940 = vst [vmem:[#allocation20_spill] sm:$0xff] %v2353_v39 }
 0x27e   : > { %v2355_v41 = vpop.f32.mrf.mxu1 }
 0x27f   : > { %v1131_v19 = vmax.f32 %v1129_v16, %v2355_v41 }
 0x280   : > { %v2357_v42 = vpop.f32.mrf.mxu1 }
 0x281   : > { %2941 = vst [vmem:[#allocation21_spill] sm:$0xff] %v2357_v42 }
 0x282   : > { %v2359_v43 = vpop.f32.mrf.mxu1 }
 0x283   : > { %2942 = vst [vmem:[#allocation22_spill] sm:$0xff] %v2359_v43  ;;  %v1132_v40 = vmax.f32 %v1130_v18, %v2359_v43 }
 0x284   : > { %v2361_v44 = vpop.f32.mrf.mxu1 }
 0x286   : > { %v2363_v45 = vpop.f32.mrf.mxu1 }
 0x287   : > { %v1133_v9 = vmax.f32 %v1131_v19, %v2363_v45 }
 0x288   : > { %v2365_v46 = vpop.f32.mrf.mxu1 }
 0x28a   : > { %v2367_v47 = vpop.f32.mrf.mxu1 }
 0x28b   : > { %2943 = vst [vmem:[#allocation23_spill] sm:$0xff] %v2367_v47  ;;  %v1134_v10 = vmax.f32 %v1132_v40, %v2367_v47 }
 0x28c   : > { %v2369_v48 = vpop.f32.mrf.mxu1 }
 0x28e   : > { %v2371_v49 = vpop.f32.mrf.mxu1 }
 0x28f   : > { %v1135_v12 = vmax.f32 %v1133_v9, %v2371_v49  ;;  %v1162_v9 = vmax.f32 %v2325_v23, %v2333_v27 }
 0x290   : > { %v2373_v50 = vpop.f32.mrf.mxu1 }
 0x292   : > { %v2375_v51 = vpop.f32.mrf.mxu1 }
 0x293   : > { %v1136_v13 = vmax.f32 %v1134_v10, %v2375_v51 }
 0x294   : > { %v2377_v52 = vpop.f32.mrf.mxu1 }
 0x296   : > { %v2379_v53 = vpop.f32.mrf.mxu1 }
 0x297   : > { %2944 = vst [vmem:[#allocation24_spill] sm:$0xff] %v2379_v53  ;;  %v1137_v15 = vmax.f32 %v1135_v12, %v2379_v53 }
 0x298   : > { %v2381_v54 = vpop.f32.mrf.mxu1 }
 0x29a   : > { %v2383_v55 = vpop.f32.mrf.mxu1 }
 0x29b   : > { %v1138_v16 = vmax.f32 %v1136_v13, %v2383_v55  ;;  %v1161_v13 = vmax.f32 %v2321_v21, %v2329_v25 }
 0x29c   : > { %v2385_v56 = vpop.f32.mrf.mxu1 }
 0x29e   : > { %v2387_v57 = vpop.f32.mrf.mxu1 }
 0x29f   : > { %v1139_v18 = vmax.f32 %v1137_v15, %v2387_v57  ;;  %v1164_v15 = vmax.f32 %v1162_v9, %v2341_v30 }
 0x2a0   : > { %v2389_v58 = vpop.f32.mrf.mxu1 }
 0x2a1   : > { %v1166_v27 = vmax.f32 %v1164_v15, %v2349_v36 }
 0x2a2   : > { %v2391_v59 = vpop.f32.mrf.mxu1 }
 0x2a3   : > { %2945 = vst [vmem:[#allocation25_spill] sm:$0xff] %v2391_v59  ;;  %v1140_v19 = vmax.f32 %v1138_v16, %v2391_v59  ;;  %v1163_v59 = vmax.f32 %v1161_v13, %v2337_v28  ;;  %v1168_v9 = vmax.f32 %v1166_v27, %v2357_v42 }
 0x2a4   : > { %v2393_v60 = vpop.f32.mrf.mxu1 }
 0x2a5   : > { %v1165_v25 = vmax.f32 %v1163_v59, %v2345_v33  ;;  %v1170_v15 = vmax.f32 %v1168_v9, %v2365_v46 }
 0x2a6   : > { %v2395_v61 = vpop.f32.mrf.mxu1 }
 0x2a7   : > { %2946 = vst [vmem:[#allocation26_spill] sm:$0xff] %v2395_v61  ;;  %v1141_v40 = vmax.f32 %v1139_v18, %v2395_v61  ;;  %v1167_v13 = vmax.f32 %v1165_v25, %v2353_v39  ;;  %v1172_v27 = vmax.f32 %v1170_v15, %v2373_v50 }
 0x2a8   : > { %v2397_v62 = vpop.f32.mrf.mxu1 }
 0x2a9   : > { %v1169_v59 = vmax.f32 %v1167_v13, %v2361_v44  ;;  %v1174_v25 = vmax.f32 %v1172_v27, %v2381_v54 }
 0x2aa   : > { %v2399_v63 = vpop.f32.mrf.mxu1 }
 0x2ab   : > { %v1142_v10 = vmax.f32 %v1140_v19, %v2399_v63  ;;  %v1171_v42 = vmax.f32 %v1169_v59, %v2369_v48 }
 0x2ac   : > { %v2401_v1 = vpop.f32.mrf.mxu1 }
 0x2ad   : > { %v1173_v9 = vmax.f32 %v1171_v42, %v2377_v52 }
 0x2ae   : > { %v2403_v2 = vpop.f32.mrf.mxu1 }
 0x2af   : > { %v1143_v12 = vmax.f32 %v1141_v40, %v2403_v2 }
 0x2b0   : > { %v2405_v3 = vpop.f32.mrf.mxu1 }
 0x2b2   : > { %v2407_v4 = vpop.f32.mrf.mxu1 }
 0x2b3   : > { %v1144_v16 = vmax.f32 %v1142_v10, %v2407_v4 }
 0x2b4   : > { %v2409_v5 = vpop.f32.mrf.mxu1 }
 0x2b6   : > { %v2411_v6 = vpop.f32.mrf.mxu1 }
 0x2b7   : > { %v1145_v18 = vmax.f32 %v1143_v12, %v2411_v6 }
 0x2b8   : > { %v2413_v7 = vpop.f32.mrf.mxu1 }
 0x2ba   : > { %v2415_v8 = vpop.f32.mrf.mxu1 }
 0x2bb   : > { %v1146_v19 = vmax.f32 %v1144_v16, %v2415_v8 }
 0x2bc   : > { %v2421_v11 = vpop.f32.mrf.mxu1 }
 0x2be   : > { %v2425_v14 = vpop.f32.mrf.mxu1 }
 0x2bf   : > { %v1147_v40 = vmax.f32 %v1145_v18, %v2425_v14 }
 0x2c0   : > { %v2429_v17 = vpop.f32.mrf.mxu1 }
 0x2c2   : > { %v2433_v38 = vpop.f32.mrf.mxu1 }
 0x2c3   : > { %v1148_v10 = vmax.f32 %v1146_v19, %v2433_v38 }
 0x2c4   : > { %v2437_v35 = vpop.f32.mrf.mxu1 }
 0x2c6   : > { %v2441_v32 = vpop.f32.mrf.mxu1 }
 0x2c7   : > { %v1149_v12 = vmax.f32 %v1147_v40, %v2441_v32 }
 0x2c8   : > { %v2445_v37 = vpop.f32.mrf.mxu1 }
 0x2ca   : > { %v2449_v43 = vpop.f32.mrf.mxu1 }
 0x2cb   : > { %2947 = vst [vmem:[#allocation27_spill] sm:$0xff] %v2449_v43  ;;  %v1150_v16 = vmax.f32 %v1148_v10, %v2449_v43  ;;  %v1176_v10 = vmax.f32 %v1174_v25, %v2389_v58 }
 0x2cc   : > { %v2453_v47 = vpop.f32.mrf.mxu1 }
 0x2cd   : > { %v1178_v13 = vmax.f32 %v1176_v10, %v2397_v62 }
 0x2ce   : > { %v2459_v53 = vpop.f32.mrf.mxu1 }
 0x2cf   : > { %2948 = vst [vmem:[#allocation28_spill] sm:$0xff] %v2459_v53  ;;  %v1151_v18 = vmax.f32 %v1149_v12, %v2459_v53  ;;  %v1175_v53 = vmax.f32 %v1173_v9, %v2385_v56 }
 0x2d0   : > { %v2466_v61 = vpop.f32.mrf.mxu1 }
 0x2d1   : > { %v1177_v15 = vmax.f32 %v1175_v53, %v2393_v60 }
 0x2d2   : > { %v2472_v23 = vpop.f32.mrf.mxu1 }
 0x2d3   : > { %v1152_v19 = vmax.f32 %v1150_v16, %v2472_v23  ;;  %v1180_v16 = vmax.f32 %v1178_v13, %v2405_v3  ;;  %v1179_v59 = vmax.f32 %v1177_v15, %v2401_v1 }
 0x2d4   : > { %v2478_v30 = vpop.f32.mrf.mxu1 }
 0x2d5   : > { %v1182_v27 = vmax.f32 %v1180_v16, %v2413_v7  ;;  %v1181_v42 = vmax.f32 %v1179_v59, %v2409_v5 }
 0x2d6   : > { %v2484_v36 = vpop.f32.mrf.mxu1 }
 0x2d7   : > { %v1153_v40 = vmax.f32 %v1151_v18, %v2484_v36  ;;  %v1183_v9 = vmax.f32 %v1181_v42, %v2421_v11 }
 0x2d9   : > { %v1154_v39 = vmax.f32 %v1152_v19, %v1153_v40  ;;  %v1184_v40 = vmax.f32 %v1182_v27, %v2429_v17  ;;  %v1185_v53 = vmax.f32 %v1183_v9, %v2437_v35 }
 0x2db   : > { %v1155_v12 = vrot.slane %v1154_v39, 4  ;;  %v1186_v10 = vmax.f32 %v1184_v40, %v2445_v37  ;;  %v1187_v15 = vmax.f32 %v1185_v53, %v2453_v47 }
 0x2dd   : > { %v1156_v43 = vmax.f32 %v1154_v39, %v1155_v12  ;;  %v2504_v39 = vpop.f32.mrf.mxu1  ;;  %v1188_v12 = vmax.f32 %v1186_v10, %v2466_v61  ;;  %v1189_v16 = vmax.f32 %v1187_v15, %v2478_v30 }
 0x2df   : > { %v1157_v18 = vrot.slane %v1156_v43, 2 }
 0x2e1   : > { %v1158_v19 = vmax.f32 %v1156_v43, %v1157_v18  ;;  %v1190_v43 = vmax.f32 %v1188_v12, %v2504_v39 }
 0x2e3   : > { %v1159_v25 = vrot.slane %v1158_v19, 1  ;;  %v1191_v42 = vmax.f32 %v1189_v16, %v1190_v43 }
 0x2e5   : > { %v2508_v13 = vmax.f32 %v1158_v19, %v1159_v25  ;;  %v1192_v53 = vrot.slane %v1191_v42, 4 }
 0x2e7   : > { %v1198_v18 = vsub.f32 %v2319_v20, %v2508_v13  ;;  %v1200_v59 = vsub.f32 %v2323_v22, %v2508_v13  ;;  %v1202_v27 = vsub.f32 %v2327_v24, %v2508_v13  ;;  %v1204_v19 = vsub.f32 %v2331_v26, %v2508_v13 }
 0x2e8   : > { %v1206_v9 = vsub.f32 %v2335_v0, %v2508_v13  ;;  %v1208_v20 = vsub.f32 %v2339_v29, %v2508_v13  ;;  %v1210_v24 = vsub.f32 %v2343_v31, %v2508_v13  ;;  %v1193_v15 = vmax.f32 %v1191_v42, %v1192_v53  ;;  %v2949_v0 = vld [vmem:[#allocation19_spill] sm:$0xff]  ;;  %v2950_v31 = vld [vmem:[#allocation22_spill] sm:$0xff] }
 0x2e9   : > { %v1262_v40 = vmul.f32 1.442695, %v1198_v18  ;;  %v1266_v25 = vmul.f32 1.442695, %v1200_v59  ;;  %v1270_v10 = vmul.f32 1.442695, %v1202_v27  ;;  %v1212_v26 = vsub.f32 %v2347_v34, %v2508_v13 }
 0x2ea   : > { %v1274_v22 = vmul.f32 1.442695, %v1204_v19  ;;  %v1278_v12 = vmul.f32 1.442695, %v1206_v9  ;;  %v1282_v43 = vmul.f32 1.442695, %v1208_v20  ;;  %v1214_v16 = vsub.f32 %v2949_v0, %v2508_v13 }
 0x2eb   : > { %1788 = vpow2.f32 %v1262_v40  ;;  %v1286_v18 = vmul.f32 1.442695, %v1210_v24  ;;  %v1194_v59 = vrot.slane %v1193_v15, 2  ;;  %v1216_v29 = vsub.f32 %v2355_v41, %v2508_v13  ;;  %v2951_v53 = vld [vmem:[#allocation23_spill] sm:$0xff] }
 0x2ec   : > { %1790 = vpow2.f32 %v1266_v25  ;;  %v1290_v27 = vmul.f32 1.442695, %v1212_v26  ;;  %v1218_v19 = vsub.f32 %v2950_v31, %v2508_v13  ;;  %v1294_v42 = vmul.f32 1.442695, %v1214_v16  ;;  %v2952_v26 = vld [vmem:[#allocation24_spill] sm:$0xff] }
 0x2ed   : > { %1792 = vpow2.f32 %v1270_v10  ;;  %v1195_v40 = vmax.f32 %v1193_v15, %v1194_v59  ;;  %v1220_v25 = vsub.f32 %v2363_v45, %v2508_v13  ;;  %v1298_v9 = vmul.f32 1.442695, %v1216_v29 }
 0x2ee   : > { %1794 = vpow2.f32 %v1274_v22  ;;  %v1222_v41 = vsub.f32 %v2951_v53, %v2508_v13  ;;  %v1224_v20 = vsub.f32 %v2371_v49, %v2508_v13  ;;  %v1302_v22 = vmul.f32 1.442695, %v1218_v19  ;;  %v2953_v19 = vld [vmem:[#allocation25_spill] sm:$0xff]  ;;  %v2954_v53 = vld [vmem:[#allocation26_spill] sm:$0xff] }
 0x2ef   : > { %1796 = vpow2.f32 %v1278_v12  ;;  %v1226_v45 = vsub.f32 %v2375_v51, %v2508_v13  ;;  %v1196_v15 = vrot.slane %v1195_v40, 1  ;;  %v1306_v0 = vmul.f32 1.442695, %v1220_v25 }
 0x2f0   : > { %1798 = vpow2.f32 %v1282_v43  ;;  %v1228_v43 = vsub.f32 %v2952_v26, %v2508_v13  ;;  %v1230_v49 = vsub.f32 %v2383_v55, %v2508_v13  ;;  %v1310_v59 = vmul.f32 1.442695, %v1222_v41 }
 0x2f1   : > { %1800 = vpow2.f32 %v1286_v18  ;;  %v1232_v29 = vsub.f32 %v2387_v57, %v2508_v13  ;;  %v1318_v25 = vmul.f32 1.442695, %v1226_v45  ;;  %v1240_v26 = vsub.f32 %v2403_v2, %v2508_v13 }
 0x2f2   : > { %1802 = vpow2.f32 %v1290_v27  ;;  %v1314_v27 = vmul.f32 1.442695, %v1224_v20  ;;  %v1322_v55 = vmul.f32 1.442695, %v1228_v43  ;;  %v1238_v20 = vsub.f32 %v2399_v63, %v2508_v13 }
 0x2f3   : > { %1804 = vpow2.f32 %v1294_v42  ;;  %v1234_v42 = vsub.f32 %v2953_v19, %v2508_v13  ;;  %v1242_v2 = vsub.f32 %v2407_v4, %v2508_v13  ;;  %v2957_v4 = vld [vmem:[#allocation16_spill] sm:$0xff] }
 0x2f4   : > { %1806 = vpow2.f32 %v1298_v9  ;;  %v2565_v9 = vmax.f32 %v1195_v40, %v1196_v15  ;;  %v1330_v40 = vmul.f32 1.442695, %v1232_v29  ;;  %v1342_v29 = vmul.f32 1.442695, %v1238_v20 }
 0x2f5   : > { %1808 = vpow2.f32 %v1302_v22  ;;  %v1326_v22 = vmul.f32 1.442695, %v1230_v49  ;;  %v1334_v43 = vmul.f32 1.442695, %v1234_v42  ;;  %v2955_v49 = vld [vmem:[#allocation14_spill] sm:$0xff] }
 0x2f6   : > { %1810 = vpow2.f32 %v1306_v0  ;;  %v1199_v0 = vsub.f32 %v2321_v21, %v2565_v9  ;;  %v2956_v21 = vld [vmem:[#allocation15_spill] sm:$0xff] }
 0x2f7   : > { %1812 = vpow2.f32 %v1310_v59  ;;  %v1201_v59 = vsub.f32 %v2955_v49, %v2565_v9  ;;  %v1203_v42 = vsub.f32 %v2956_v21, %v2565_v9  ;;  %v1211_v21 = vsub.f32 %v2345_v33, %v2565_v9 }
 0x2f8   : > { %v2535_v34 = vpop.eup %1788  ;;  %1814 = vpow2.f32 %v1314_v27  ;;  %v1346_v27 = vmul.f32 1.442695, %v1240_v26  ;;  %v1246_v26 = vsub.f32 %v2415_v8, %v2508_v13  ;;  %v2958_v8 = vld [vmem:[#allocation17_spill] sm:$0xff] }
 0x2f9   : > { %v2539_v10 = vpop.eup %1790  ;;  %1816 = vpow2.f32 %v1318_v25  ;;  %v1268_v20 = vmul.f32 1.442695, %v1201_v59  ;;  %v1209_v59 = vsub.f32 %v2958_v8, %v2565_v9 }
 0x2fa   : > { %v1390_v24 = vadd.f32 %v2539_v10, %v2535_v34  ;;  %v2547_v12 = vpop.eup %1792  ;;  %1818 = vpow2.f32 %v1322_v55 }
 0x2fb   : > { %v2554_v18 = vpop.eup %1794  ;;  %1820 = vpow2.f32 %v1326_v22 }
 0x2fc   : > { %v1391_v16 = vadd.f32 %v2547_v12, %v1390_v24  ;;  %v2561_v31 = vpop.eup %1796  ;;  %v1236_v24 = vsub.f32 %v2954_v53, %v2508_v13  ;;  %1822 = vpow2.f32 %v1330_v40  ;;  %v1244_v53 = vsub.f32 %v2411_v6, %v2508_v13 }
 0x2fd   : > { %v2570_v57 = vpop.eup %1798  ;;  %1824 = vpow2.f32 %v1334_v43  ;;  %v1350_v40 = vmul.f32 1.442695, %v1242_v2  ;;  %v1207_v6 = vsub.f32 %v2337_v28, %v2565_v9  ;;  %v1272_v43 = vmul.f32 1.442695, %v1203_v42 }
 0x2fe   : > { %v1392_v51 = vadd.f32 %v2554_v18, %v1391_v16  ;;  %v2577_v15 = vpop.eup %1800  ;;  %v1338_v16 = vmul.f32 1.442695, %v1236_v24  ;;  %v1264_v24 = vmul.f32 1.442695, %v1199_v0  ;;  %v1250_v28 = vsub.f32 %v2433_v38, %v2508_v13 }
 0x2ff   : > { %v1280_v42 = vmul.f32 1.442695, %v1207_v6 }
 0x300   : > { %v1393_v41 = vadd.f32 %v2561_v31, %v1392_v51  ;;  %v2584_v51 = vpop.eup %1802  ;;  %1826 = vpow2.f32 %v1338_v16  ;;  %v1248_v16 = vsub.f32 %v2425_v14, %v2508_v13  ;;  %v1366_v33 = vmul.f32 1.442695, %v1250_v28 }
 0x301   : > { %v2591_v25 = vpop.eup %1804  ;;  %1828 = vpow2.f32 %v1342_v29 }
 0x302   : > { %v1394_v45 = vadd.f32 %v2570_v57, %v1393_v41  ;;  %v1205_v41 = vsub.f32 %v2957_v4, %v2565_v9  ;;  %v2598_v22 = vpop.eup %1806  ;;  %1830 = vpow2.f32 %v1346_v27  ;;  %v1358_v27 = vmul.f32 1.442695, %v1246_v26 }
 0x303   : > { %v2605_v0 = vpop.eup %1808  ;;  %1832 = vpow2.f32 %v1264_v24  ;;  %v1252_v24 = vsub.f32 %v2441_v32, %v2508_v13  ;;  %v1284_v26 = vmul.f32 1.442695, %v1209_v59  ;;  %v2963_v59 = vld [vmem:[#allocation21_spill] sm:$0xff] }
 0x304   : > { %v1395_v63 = vadd.f32 %v2577_v15, %v1394_v45  ;;  %1834 = vpow2.f32 %v1268_v20  ;;  %v1276_v2 = vmul.f32 1.442695, %v1205_v41  ;;  %v2612_v29 = vpop.eup %1810  ;;  %v2959_v41 = vld [vmem:[#allocation18_spill] sm:$0xff] }
 0x305   : > { %1836 = vpow2.f32 %v1350_v40  ;;  %v1213_v20 = vsub.f32 %v2959_v41, %v2565_v9  ;;  %v1370_v8 = vmul.f32 1.442695, %v1252_v24 }
 0x306   : > { %v1396_v19 = vadd.f32 %v2584_v51, %v1395_v63  ;;  %v1354_v63 = vmul.f32 1.442695, %v1244_v53  ;;  %1838 = vpow2.f32 %v1272_v43 }
 0x308   : > { %v1397_v55 = vadd.f32 %v2591_v25, %v1396_v19  ;;  %v2616_v19 = vpop.eup %1812  ;;  %1840 = vpow2.f32 %v1354_v63  ;;  %v1288_v63 = vmul.f32 1.442695, %v1211_v21 }
 0x309   : > { %v2621_v53 = vpop.eup %1814  ;;  %1842 = vpow2.f32 %v1276_v2  ;;  %v1217_v2 = vsub.f32 %v2963_v59, %v2565_v9 }
 0x30a   : > { %v1398_v45 = vadd.f32 %v2598_v22, %v1397_v55  ;;  %v1362_v55 = vmul.f32 1.442695, %v1248_v16  ;;  %v2625_v4 = vpop.eup %1816  ;;  %1844 = vpow2.f32 %v1358_v27  ;;  %v1229_v16 = vsub.f32 %v2381_v54, %v2565_v9 }
 0x30b   : > { %v2630_v40 = vpop.eup %1818  ;;  %1846 = vpow2.f32 %v1280_v42  ;;  %v1219_v54 = vsub.f32 %v2361_v44, %v2565_v9 }
 0x30c   : > { %v1399_v49 = vadd.f32 %v2605_v0, %v1398_v45  ;;  %v2960_v45 = vld [vmem:[#allocation20_spill] sm:$0xff]  ;;  %v2634_v43 = vpop.eup %1820  ;;  %1848 = vpow2.f32 %v1362_v55  ;;  %v1225_v55 = vsub.f32 %v2373_v50, %v2565_v9  ;;  %v2967_v50 = vld [vmem:[#allocation27_spill] sm:$0xff] }
 0x30d   : > { %v1215_v6 = vsub.f32 %v2960_v45, %v2565_v9  ;;  %2961 = vst [vmem:[#allocation19_spill] sm:$0xff] %v2634_v43  ;;  %1850 = vpow2.f32 %v1284_v26  ;;  %v1324_v45 = vmul.f32 1.442695, %v1229_v16  ;;  %v1254_v16 = vsub.f32 %v2967_v50, %v2508_v13 }
 0x30e   : > { %v1400_v14 = vadd.f32 %v2612_v29, %v1399_v49  ;;  %v2639_v49 = vpop.eup %1822  ;;  %1852 = vpow2.f32 %v1366_v33  ;;  %v1223_v33 = vsub.f32 %v2369_v48, %v2565_v9  ;;  %v2968_v48 = vld [vmem:[#allocation28_spill] sm:$0xff] }
 0x30f   : > { %2962 = vst [vmem:[#allocation22_spill] sm:$0xff] %v2639_v49  ;;  %v2643_v28 = vpop.eup %1824  ;;  %v1296_v21 = vmul.f32 1.442695, %v1215_v6  ;;  %1854 = vpow2.f32 %v1288_v63  ;;  %v1304_v63 = vmul.f32 1.442695, %v1219_v54 }
 0x310   : > { %v1401_v38 = vadd.f32 %v2616_v19, %v1400_v14  ;;  %2964 = vst [vmem:[#allocation23_spill] sm:$0xff] %v2643_v28  ;;  %v1227_v14 = vsub.f32 %v2377_v52, %v2565_v9  ;;  %v2648_v41 = vpop.eup %1826  ;;  %1856 = vpow2.f32 %v1370_v8  ;;  %v1221_v52 = vsub.f32 %v2365_v46, %v2565_v9 }
 0x311   : > { %2965 = vst [vmem:[#allocation24_spill] sm:$0xff] %v2648_v41  ;;  %v2652_v42 = vpop.eup %1828 }
 0x312   : > { %v1402_v32 = vadd.f32 %v2621_v53, %v1401_v38  ;;  %v1292_v38 = vmul.f32 1.442695, %v1213_v20  ;;  %2966 = vst [vmem:[#allocation25_spill] sm:$0xff] %v2652_v42  ;;  %v1300_v20 = vmul.f32 1.442695, %v1217_v2 }
 0x313   : > { %v1320_v6 = vmul.f32 1.442695, %v1227_v14  ;;  %v1316_v2 = vmul.f32 1.442695, %v1225_v55  ;;  %v1256_v14 = vsub.f32 %v2968_v48, %v2508_v13 }
 0x314   : > { %v1403_v27 = vadd.f32 %v2625_v4, %v1402_v32  ;;  %v2657_v32 = vpop.eup %1830  ;;  %1858 = vpow2.f32 %v1292_v38  ;;  %v1308_v38 = vmul.f32 1.442695, %v1221_v52 }
 0x315   : > { %v2661_v26 = vpop.eup %1832  ;;  %1860 = vpow2.f32 %v1296_v21  ;;  %v1312_v21 = vmul.f32 1.442695, %v1223_v33  ;;  %v1260_v33 = vsub.f32 %v2484_v36, %v2508_v13  ;;  %v1231_v36 = vsub.f32 %v2385_v56, %v2565_v9 }
 0x316   : > { %v1404_v24 = vadd.f32 %v2630_v40, %v1403_v27  ;;  %v2666_v59 = vpop.eup %1834  ;;  %1862 = vpow2.f32 %v1324_v45  ;;  %v1258_v45 = vsub.f32 %v2472_v23, %v2508_v13  ;;  %v1235_v56 = vsub.f32 %v2393_v60, %v2565_v9 }
 0x317   : > { %v2670_v8 = vpop.eup %1836  ;;  %v1427_v27 = vadd.f32 %v2666_v59, %v2661_v26  ;;  %1864 = vpow2.f32 %v1300_v20 }
 0x318   : > { %v1405_v44 = vadd.f32 %v2634_v43, %v1404_v24  ;;  %v2675_v24 = vpop.eup %1838  ;;  %1866 = vpow2.f32 %v1320_v6 }
 0x319   : > { %v2679_v43 = vpop.eup %1840  ;;  %1868 = vpow2.f32 %v1304_v63 }
 0x31a   : > { %v1406_v46 = vadd.f32 %v2639_v49, %v1405_v44  ;;  %v1428_v44 = vadd.f32 %v2675_v24, %v1427_v27  ;;  %v2683_v55 = vpop.eup %1842  ;;  %v1374_v49 = vmul.f32 1.442695, %v1254_v16  ;;  %1870 = vpow2.f32 %v1316_v2 }
 0x31b   : > { %v2687_v50 = vpop.eup %1844  ;;  %1872 = vpow2.f32 %v1308_v38  ;;  %v1382_v27 = vmul.f32 1.442695, %v1258_v45  ;;  %v1233_v45 = vsub.f32 %v2389_v58, %v2565_v9  ;;  %v1237_v58 = vsub.f32 %v2397_v62, %v2565_v9 }
 0x31c   : > { %v1407_v54 = vadd.f32 %v2643_v28, %v1406_v46  ;;  %v1429_v52 = vadd.f32 %v2683_v55, %v1428_v44  ;;  %v2691_v48 = vpop.eup %1846  ;;  %v1378_v46 = vmul.f32 1.442695, %v1256_v14  ;;  %1874 = vpow2.f32 %v1312_v21 }
 0x31d   : > { %v2695_v6 = vpop.eup %1848  ;;  %1876 = vpow2.f32 %v1374_v49  ;;  %v1386_v14 = vmul.f32 1.442695, %v1260_v33  ;;  %v1332_v28 = vmul.f32 1.442695, %v1233_v45  ;;  %v1336_v62 = vmul.f32 1.442695, %v1235_v56 }
 0x31e   : > { %v1408_v20 = vadd.f32 %v2648_v41, %v1407_v54  ;;  %v1430_v63 = vadd.f32 %v2691_v48, %v1429_v52  ;;  %v2699_v16 = vpop.eup %1850  ;;  %1878 = vpow2.f32 %v1378_v46  ;;  %v1241_v45 = vsub.f32 %v2405_v3, %v2565_v9 }
 0x31f   : > { %v2701_v2 = vpop.eup %1852  ;;  %1880 = vpow2.f32 %v1382_v27 }
 0x320   : > { %v1409_v23 = vadd.f32 %v2652_v42, %v1408_v20  ;;  %v1431_v13 = vadd.f32 %v2699_v16, %v1430_v63  ;;  %v2707_v38 = vpop.eup %1854  ;;  %1882 = vpow2.f32 %v1386_v14 }
 0x321   : > { %v2709_v44 = vpop.eup %1856 }
 0x322   : > { %v1410_v54 = vadd.f32 %v2657_v32, %v1409_v23  ;;  %v1432_v49 = vadd.f32 %v2707_v38, %v1431_v13  ;;  %v2715_v20 = vpop.eup %1858  ;;  %v1328_v23 = vmul.f32 1.442695, %v1231_v36  ;;  %v1239_v36 = vsub.f32 %v2401_v1, %v2565_v9 }
 0x323   : > { %v2719_v52 = vpop.eup %1860  ;;  %v1340_v1 = vmul.f32 1.442695, %v1237_v58  ;;  %v1348_v58 = vmul.f32 1.442695, %v1241_v45  ;;  %v1259_v45 = vsub.f32 %v2478_v30, %v2565_v9 }
 0x324   : > { %v1411_v21 = vadd.f32 %v2670_v8, %v1410_v54  ;;  %v1433_v46 = vadd.f32 %v2715_v20, %v1432_v49  ;;  %v2723_v63 = vpop.eup %1862  ;;  %1884 = vpow2.f32 %v1328_v23  ;;  %v1243_v23 = vsub.f32 %v2409_v5, %v2565_v9 }
 0x325   : > { %v1865_v54 = vpop.eup %1864  ;;  %1464 = vmatprep.subr.mxu0 %v2723_v63  ;;  %1886 = vpow2.f32 %v1332_v28  ;;  %v1245_v28 = vsub.f32 %v2413_v7, %v2565_v9 }
 0x326   : > { %v1412_v33 = vadd.f32 %v2679_v43, %v1411_v21  ;;  %v1434_v60 = vadd.f32 %v2719_v52, %v1433_v46  ;;  %v1867_v27 = vpop.eup %1866  ;;  %1465 = vmatpush1.msra.mxu0 %v2630_v40  ;;  %1888 = vpow2.f32 %v1336_v62  ;;  %v1249_v62 = vsub.f32 %v2429_v17, %v2565_v9 }
 0x327   : > { %v1869_v21 = vpop.eup %1868  ;;  %1466 = vmatprep.subr.mxu0 %v1867_v27  ;;  %1890 = vpow2.f32 %v1340_v1 }
 0x328   : > { %v1413_v13 = vadd.f32 %v2687_v50, %v1412_v33  ;;  %v1435_v41 = vadd.f32 %v1865_v54, %v1434_v60  ;;  %v1871_v14 = vpop.eup %1870  ;;  %1467 = vmatpush1.msra.mxu0 %v2625_v4  ;;  %v1247_v60 = vsub.f32 %v2421_v11, %v2565_v9 }
 0x329   : > { %v1873_v33 = vpop.eup %1872  ;;  %1468 = vmatprep.subr.mxu0 %v1871_v14 }
 0x32a   : > { %v1414_v49 = vadd.f32 %v2695_v6, %v1413_v13  ;;  %v1436_v42 = vadd.f32 %v1869_v21, %v1435_v41  ;;  %v1875_v40 = vpop.eup %1874  ;;  %1469 = vmatpush1.msra.mxu0 %v2621_v53  ;;  %v1344_v13 = vmul.f32 1.442695, %v1239_v36  ;;  %v1360_v17 = vmul.f32 1.442695, %v1247_v60 }
 0x32b   : > { %1470 = vmatprep.subr.mxu0 %v1875_v40  ;;  %v2742_v4 = vpop.eup %1876 }
 0x32c   : > { %v1415_v46 = vadd.f32 %v2701_v2, %v1414_v49  ;;  %v1437_v3 = vadd.f32 %v1873_v33, %v1436_v42  ;;  %1471 = vmatpush1.msra.mxu0 %v2616_v19  ;;  %v2748_v53 = vpop.eup %1878  ;;  %v1261_v42 = vsub.f32 %v2504_v39, %v2565_v9  ;;  %1892 = vpow2.f32 %v1344_v13 }
 0x32d   : > { %1472 = vmatprep.subr.mxu0 %v1873_v33  ;;  %v1352_v19 = vmul.f32 1.442695, %v1243_v23  ;;  %v2756_v49 = vpop.eup %1880  ;;  %1894 = vpow2.f32 %v1348_v58  ;;  %v1356_v39 = vmul.f32 1.442695, %v1245_v28 }
 0x32e   : > { %v1416_v56 = vadd.f32 %v2709_v44, %v1415_v46  ;;  %v1438_v5 = vadd.f32 %v1875_v40, %v1437_v3  ;;  %1473 = vmatpush1.msra.mxu0 %v2612_v29  ;;  %v2764_v33 = vpop.eup %1882 }
 0x32f   : > { %1474 = vmatprep.subr.mxu0 %v1869_v21  ;;  %v1251_v21 = vsub.f32 %v2437_v35, %v2565_v9  ;;  %1896 = vpow2.f32 %v1352_v19  ;;  %v1253_v35 = vsub.f32 %v2445_v37, %v2565_v9 }
 0x330   : > { %v1417_v41 = vadd.f32 %v2742_v4, %v1416_v56  ;;  %v1439_v36 = vadd.f32 %v1871_v14, %v1438_v5  ;;  %1475 = vmatpush1.msra.mxu0 %v2605_v0  ;;  %v1257_v14 = vsub.f32 %v2466_v61, %v2565_v9  ;;  %v1388_v0 = vmul.f32 1.442695, %v1261_v42 }
 0x331   : > { %1476 = vmatprep.subr.mxu0 %v1865_v54  ;;  %v2776_v54 = vpop.eup %1884  ;;  %v1255_v61 = vsub.f32 %v2453_v47, %v2565_v9  ;;  %1898 = vpow2.f32 %v1356_v39  ;;  %v1372_v47 = vmul.f32 1.442695, %v1253_v35 }
 0x332   : > { %v1418_v7 = vadd.f32 %v2748_v53, %v1417_v41  ;;  %v1440_v29 = vadd.f32 %v1867_v27, %v1439_v36  ;;  %1477 = vmatpush1.msra.mxu0 %v2598_v22  ;;  %v1364_v27 = vmul.f32 1.442695, %v1249_v62  ;;  %v1384_v22 = vmul.f32 1.442695, %v1259_v45  ;;  %v2976_v36 = vld [vmem:[#allocation19_spill] sm:$0xff] }
 0x333   : > { %1478 = vmatprep.subr.mxu0 %v2719_v52  ;;  %1900 = vpow2.f32 %v1360_v17  ;;  %v1368_v52 = vmul.f32 1.442695, %v1251_v21  ;;  %v1380_v40 = vmul.f32 1.442695, %v1257_v14  ;;  %v1376_v9 = vmul.f32 1.442695, %v1255_v61 }
 0x334   : > { %v1419_v11 = vadd.f32 %v2756_v49, %v1418_v7  ;;  %v1441_v46 = vadd.f32 %v2723_v63, %v1440_v29  ;;  %1479 = vmatpush1.msra.mxu0 %v2591_v25  ;;  %v2785_v63 = vpop.eup %1886  ;;  %1902 = vpow2.f32 %v1388_v0 }
 0x335   : > { %1480 = vmatprep.subr.mxu0 %v2715_v20  ;;  %v2790_v25 = vpop.eup %1888  ;;  %1904 = vpow2.f32 %v1364_v27  ;;  %v1544_v27 = vstv %s1543_s27 }
 0x336   : > { %v2772_v30 = vadd.f32 %v2764_v33, %v1419_v11  ;;  %v1442_v1 = vadd.f32 %v2776_v54, %v1441_v46  ;;  %1481 = vmatpush1.msra.mxu0 %v2584_v51  ;;  %1906 = vpow2.f32 %v1384_v22  ;;  %v2795_v23 = vpop.eup %1890 }
 0x337   : > { %1482 = vmatprep.subr.mxu0 %v2707_v38  ;;  %1908 = vpow2.f32 %v1368_v52 }
 0x338   : > { %v1443_v37 = vadd.f32 %v2785_v63, %v1442_v1  ;;  %1483 = vmatpush1.msra.mxu0 %v2577_v15  ;;  %1910 = vpow2.f32 %v1380_v40  ;;  %v1421_v45 = vrot.slane %v2772_v30, 4 }
 0x339   : > { %1484 = vmatprep.subr.mxu0 %v2699_v16  ;;  %v1893_v38 = vpop.eup %1892  ;;  %1912 = vpow2.f32 %v1372_v47 }
 0x33a   : > { %v1444_v20 = vadd.f32 %v2790_v25, %v1443_v37  ;;  %1485 = vmatpush1.msra.mxu0 %v2570_v57  ;;  %1914 = vpow2.f32 %v1376_v9  ;;  %v1895_v56 = vpop.eup %1894  ;;  %v1422_v39 = vadd.f32 %v1421_v45, %v2772_v30 }
 0x33b   : > { %1486 = vmatprep.subr.mxu0 %v2691_v48 }
 0x33c   : > { %v1445_v51 = vadd.f32 %v2795_v23, %v1444_v20  ;;  %1487 = vmatpush1.msra.mxu0 %v2561_v31  ;;  %v1897_v57 = vpop.eup %1896 }
 0x33d   : > { %1488 = vmatprep.subr.mxu0 %v2683_v55 }
 0x33e   : > { %v1446_v15 = vadd.f32 %v1893_v38, %v1445_v51  ;;  %1489 = vmatpush1.msra.mxu0 %v2554_v18  ;;  %v1899_v48 = vpop.eup %1898  ;;  %v1921_v51 = vld [vmem:[%s2193_s24 + $0x8] sm:$0xff] }
 0x33f   : > { %1490 = vmatprep.subr.mxu0 %v2675_v24 }
 0x340   : > { %v1447_v16 = vadd.f32 %v1895_v56, %v1446_v15  ;;  %1491 = vmatpush1.msra.mxu0 %v2547_v12  ;;  %v1901_v31 = vpop.eup %1900 }
 0x341   : > { %1492 = vmatprep.subr.mxu0 %v2666_v59  ;;  %v1903_v55 = vpop.eup %1902 }
 0x342   : > { %v1448_v13 = vadd.f32 %v1897_v57, %v1447_v16  ;;  %1493 = vmatpush1.msra.mxu0 %v2539_v10  ;;  %v1905_v18 = vpop.eup %1904  ;;  %v1922_v16 = vld [vmem:[%s2193_s24 + $0x10] sm:$0xff] }
 0x343   : > { %1494 = vmatprep.subr.mxu0 %v2661_v26  ;;  %v1907_v24 = vpop.eup %1906 }
 0x344   : > { %v1449_v3 = vadd.f32 %v1899_v48, %v1448_v13  ;;  %1495 = vmatpush1.msra.mxu0 %v2535_v34  ;;  %v1909_v12 = vpop.eup %1908 }
 0x345   : > { %1496 = vmatprep.subr.mxu0 %v1903_v55  ;;  %v1911_v59 = vpop.eup %1910 }
 0x346   : > { %v1450_v28 = vadd.f32 %v1901_v31, %v1449_v3  ;;  %1497 = vmatpush2.msra.mxu0 %v2764_v33  ;;  %v1913_v10 = vpop.eup %1912  ;;  %v1423_v33 = vrot.slane %v1422_v39, 2 }
 0x347   : > { %1498 = vmatprep.subr.mxu0 %v1907_v24  ;;  %v1915_v5 = vpop.eup %1914 }
 0x348   : > { %v1451_v41 = vadd.f32 %v1905_v18, %v1450_v28  ;;  %1499 = vmatpush2.msra.mxu0 %v2756_v49  ;;  %v2977_v49 = vld [vmem:[#allocation12_spill] sm:$0xff]  ;;  %v1424_v14 = vadd.f32 %v1423_v33, %v1422_v39 }
 0x349   : > { %1500 = vmatprep.subr.mxu0 %v1911_v59 }
 0x34a   : > { %v1452_v58 = vadd.f32 %v1909_v12, %v1451_v41  ;;  %1501 = vmatpush2.msra.mxu0 %v2748_v53  ;;  %v604_v53 = vpop.permute.xlu0 %603  ;;  %v1425_v0 = vrot.slane %v1424_v14, 1 }
 0x34b   : > { %1502 = vmatprep.subr.mxu0 %v1915_v5  ;;  %v613_v62 = vadd.f32 %v604_v53, %v2977_v49 }
 0x34c   : > { %v1453_v26 = vadd.f32 %v1913_v10, %v1452_v58  ;;  %1503 = vmatpush2.msra.mxu0 %v2742_v4 }
 0x34d   : > { %1504 = vmatprep.subr.mxu0 %v1913_v10 }
 0x34e   : > { %v1454_v34 = vadd.f32 %v1915_v5, %v1453_v26  ;;  %1505 = vmatpush2.msra.mxu0 %v2709_v44  ;;  %v2969_v44 = vld [vmem:[#allocation25_spill] sm:$0xff] }
 0x34f   : > { %1506 = vmatprep.subr.mxu0 %v1909_v12 }
 0x350   : > { %v1455_v60 = vadd.f32 %v1911_v59, %v1454_v34  ;;  %1507 = vmatpush2.msra.mxu0 %v2701_v2  ;;  %v2970_v2 = vld [vmem:[#allocation24_spill] sm:$0xff] }
 0x351   : > { %1508 = vmatprep.subr.mxu0 %v1905_v18 }
 0x352   : > { %v1456_v42 = vadd.f32 %v1907_v24, %v1455_v60  ;;  %1509 = vmatpush2.msra.mxu0 %v2695_v6  ;;  %v2971_v6 = vld [vmem:[#allocation23_spill] sm:$0xff] }
 0x353   : > { %1510 = vmatprep.subr.mxu0 %v1901_v31 }
 0x354   : > { %v1457_v7 = vadd.f32 %v1903_v55, %v1456_v42  ;;  %1511 = vmatpush2.msra.mxu0 %v2687_v50  ;;  %v2973_v50 = vld [vmem:[#allocation10_spill] sm:$0xff] }
 0x355   : > { %1512 = vmatprep.subr.mxu0 %v1899_v48  ;;  %v1923_v48 = vld [vmem:[%s2193_s24 + $0x18] sm:$0xff] }
 0x356   : > { %1513 = vmatpush2.msra.mxu0 %v2679_v43  ;;  %v2972_v43 = vld [vmem:[#allocation22_spill] sm:$0xff]  ;;  %v1458_v11 = vrot.slane %v1457_v7, 4 }
 0x357   : > { %1514 = vmatprep.subr.mxu0 %v1897_v57 }
 0x358   : > { %1515 = vmatpush2.msra.mxu0 %v2670_v8  ;;  %v2974_v8 = vld [vmem:[#allocation11_spill] sm:$0xff]  ;;  %v1459_v29 = vadd.f32 %v1458_v11, %v1457_v7 }
 0x359   : > { %1516 = vmatprep.subr.mxu0 %v1895_v56  ;;  %v611_v4 = vadd.f32 %v2974_v8, %v2973_v50 }
 0x35a   : > { %1517 = vmatpush2.msra.mxu0 %v2657_v32  ;;  %v2975_v32 = vld [vmem:[#allocation13_spill] sm:$0xff]  ;;  %v1460_v21 = vrot.slane %v1459_v29, 2 }
 0x35b   : > { %1518 = vmatprep.subr.mxu0 %v1893_v38  ;;  %v614_v19 = vadd.f32 %v604_v53, %v2975_v32 }
 0x35c   : > { %1519 = vmatpush2.msra.mxu0 %v2969_v44  ;;  %v1461_v17 = vadd.f32 %v1460_v21, %v1459_v29 }
 0x35d   : > { %1520 = vmatprep.subr.mxu0 %v2795_v23 }
 0x35e   : > { %1521 = vmatpush2.msra.mxu0 %v2970_v2  ;;  %v1462_v46 = vrot.slane %v1461_v17, 1 }
 0x35f   : > { %1522 = vmatprep.subr.mxu0 %v2790_v25  ;;  %v1920_v25 = vld [vmem:[%s2193_s24] sm:$0xff] }
 0x360   : > { %1523 = vmatpush2.msra.mxu0 %v2971_v6  ;;  %v1463_v35 = vadd.f32 %v1462_v46, %v1461_v17 }
 0x361   : > { %1524 = vmatprep.subr.mxu0 %v2785_v63 }
 0x362   : > { %1525 = vmatpush2.msra.mxu0 %v2972_v43 }
 0x363   : > { %1526 = vmatprep.subr.mxu0 %v2776_v54  ;;  %v1426_v54 = vadd.f32 %v1425_v0, %v1424_v14 }
 0x364   : > { %1527 = vmatpush2.msra.mxu0 %v2976_v36 }
 0x365   : > { %1529 = vmatmul.mubr.f32.vlgmr.msra.gmra.mxu0 %v611_v4  ;;  %1916 = vrcp.f32 %v1426_v54 }
 0x366   : > { %1534 = vmatprep.mubr.f32.mxu0 %v614_v19  ;;  %1918 = vrcp.f32 %v1463_v35 }
 0x369   : > { %1535 = vmatmul.mubr.f32.gmra.mxu0 %v613_v62 }
 0x372   : > { %v1917_v1 = vpop.eup %1916 }
 0x373   : > { %v1919_v40 = vpop.eup %1918 }
 0x425   : > { %v1530_v61 = vpop.f32.mrf.mxu0 }
 0x426   : > { %v1545_v22 = vmul.f32 %v1544_v27, %v1530_v61 }
 0x427   : > { %v1532_v30 = vpop.f32.mrf.mxu0 }
 0x428   : > { %v1549_v63 = vmul.f32 %v1917_v1, %v1545_v22  ;;  %v1546_v52 = vmul.f32 %v1544_v27, %v1532_v30 }
 0x429   : > { %v1536_v37 = vpop.f32.mrf.mxu0 }
 0x42a   : > { %v1553_v47 = vadd.f32 %v1920_v25, %v1549_v63  ;;  %v1550_v9 = vmul.f32 %v1919_v40, %v1546_v52  ;;  %v1547_v20 = vmul.f32 %v1544_v27, %v1536_v37 }
 0x42b   : > { %v1538_v23 = vpop.f32.mrf.mxu0 }
 0x42c   : > { %1557 = vst [vmem:[%s381_s28] sm:$0xff] %v1553_v47  ;;  %v1554_v38 = vadd.f32 %v1921_v51, %v1550_v9  ;;  %v1551_v15 = vmul.f32 %v1917_v1, %v1547_v20  ;;  %v1548_v56 = vmul.f32 %v1544_v27, %v1538_v23 }
 0x42e   : > { %1558 = vst [vmem:[%s381_s28 + $0x8] sm:$0xff] %v1554_v38  ;;  %v1555_v57 = vadd.f32 %v1922_v16, %v1551_v15  ;;  %v1552_v13 = vmul.f32 %v1919_v40, %v1548_v56 }
 0x430   : > { %1559 = vst [vmem:[%s381_s28 + $0x10] sm:$0xff] %v1555_v57  ;;  %v1556_v31 = vadd.f32 %v1923_v48, %v1552_v13 }
 0x432   : > { %1560 = vst [vmem:[%s381_s28 + $0x18] sm:$0xff] %v1556_v31 }
 0x433   : > { %1965 = shalt.err (!%p1962_p0)
}
 0x434   : > { %s1966_s24 = scalar_lea.hbm %s2846_s17, 512  ;;  %s1970_s28 = scalar_lea.hbm %s2899_s9, 1024 }
 0x435   : > { %p1967_p2 = scmp.ne.s32.totalorder %s2846_s17, %s1966_s24  ;;  %p1971_p3 = scmp.lt.s32.totalorder %s2846_s17, %s2899_s9 }
 0x436   : > { %p1972_p6 = scmp.lt.s32.totalorder %s1970_s28, %s1966_s24 }
 0x437   : > { %p1968_p9 = pnand %p1967_p2, %p2978_p13 }
 0x438   : > { %p1973_p11 = por %p1972_p6, %p1971_p3 }
 0x439   : > { %p1969_p1 = pneg %p1968_p9 }
 0x43b   : > { %p1974_p12 = pnand %p1973_p11, %p1969_p1 }
 0x43d   : > { %1977 = shalt.err (!%p1974_p12)
}
 0x43e   : > { %s2024_s15 = smov 256   ;;  %s2025_s0 = smov 16  }
 0x43f   : > { %1737 = dma.vmem_to_hbm [thread:$0]  (%p2978_p13), %s2840_s29, 512, %s2846_s17, %s1562_s21, %s2024_s15, %s2024_s15, %s2025_s0  }
 0x440 PF: > { %s1590_s20 = sand.u32 1, %s2004_s11   ;;  %p2979_p4 = scmp.ne.s32.totalorder %s2927_s23, 0 }
 0x441   : > { %p2980_p5 = scmp.ge.s32.totalorder %s2016_s14, 2  ;;  %s1591_s30 = scalar_lea.sflag [#allocation5], %s1590_s20 }
 0x443   : > { %p1744_p7 = pnand %p2980_p5, %p2979_p4 }
 0x445   : > { %p1745_p8 = pneg %p1744_p7 }
 0x447   : > { %1999 = dma.done.wait (%p1745_p8), %s1591_s30, 512  }
 0x448   : > { %2001 = vsyncadd (%p1745_p8), %s1591_s30, 4294966784  ;;  %s2981_s25 = sld [smem:[#allocation9_spill]]  ;;  %p23_p10 = scmp.ge.s32.totalorder %s2104_s16, 4  }
 0x449   : > { %s2982_s11 = smov %s2008_s12  ;;  %s2983_s12 = smov %s2012_s13 }
 0x44a   : > { %s2985_s14 = smov %s2104_s16  ;;  %25 = sbr.rel (!%p23_p10) target bundleno = 7 (0x7), region = 107 }
 0x44e   : > { %s2984_s13 = smov %s2981_s25 }
 0x44f   :  { %1596 = vsyncpa [#allocation4], 1 }
 0x450   :  { %1598 = vsyncpa [#allocation4 + $0x1], 1 }
 0x451   :  { %1599 = vsyncpa [#allocation5], 1 }
 0x452   :  { %1601 = vsyncpa [#allocation5 + $0x1], 1 }

</bundles_post_ra>
